<compile_context>
chip_gen: v7x
topology: tpu7x:2x2x1
jax: 0.10.0
libtpu: 0.0.40
codegen_flags: <defaults>
</compile_context>

<pallas_src>
import jax
import jax.numpy as jnp
from jax.experimental import pallas as pl
from jax.experimental.pallas import tpu as pltpu


def _sigmoid_mul_kernel(s_ref, x_ref, o_ref):
    # s_ref: (TR, 1)  gate logits for these rows (one row == one (b, c) pair)
    # x_ref: (TR, HW) activations; o_ref: (TR, HW) output
    gate = jax.nn.sigmoid(s_ref[...].astype(jnp.float32)).astype(x_ref.dtype)
    o_ref[...] = x_ref[...] * gate          # lane-broadcast of (TR,1) over HW


def _choose_tile_rows(bc, hw, itemsize):
    # Aim for ~2 MiB per activation tile (mem-bound sweet spot), multiple of
    # 8 sublanes, never exceeding the full row extent.
    target_bytes = 2 * 1024 * 1024
    rows = target_bytes // max(1, hw * itemsize)
    rows = max(8, (int(rows) // 8) * 8)
    return min(rows, bc)


def sigmoid_mul(x253, x249, *, tile_rows=None):
    """x253: (B, C, 1, 1), x249: (B, C, H, W)  ->  sigmoid(x253) * x249 (NCHW)."""
    B, C, H, W = x249.shape
    assert x253.shape == (B, C, 1, 1)
    BC, HW = B * C, H * W

    # Free, contiguity-preserving views (no transpose, no extra HBM traffic).
    x_flat = x249.reshape(BC, HW)
    s_flat = x253.reshape(BC, 1)

    itemsize = jnp.dtype(x249.dtype).itemsize
    if tile_rows is None:
        tile_rows = _choose_tile_rows(BC, HW, itemsize)
    tile_rows = min(tile_rows, BC)

    grid = (pl.cdiv(BC, tile_rows),)

    # Double-buffered in/out tiles + tiny gate tiles, with headroom; clamp to
    # a limit that is safe on every generation (v7x physical VMEM = 64 MiB).
    tile_bytes = tile_rows * HW * itemsize
    vmem_bytes = int(min(max(6 * tile_bytes, 16 * 1024 * 1024),
                         32 * 1024 * 1024))

    out = pl.pallas_call(
        _sigmoid_mul_kernel,
        out_shape=jax.ShapeDtypeStruct((BC, HW), x249.dtype),
        grid_spec=pltpu.PrefetchScalarGridSpec(
            num_scalar_prefetch=0,
            grid=grid,
            in_specs=[
                pl.BlockSpec((tile_rows, 1), lambda i: (i, 0)),    # gate rows
                pl.BlockSpec((tile_rows, HW), lambda i: (i, 0)),   # activations
            ],
            out_specs=pl.BlockSpec((tile_rows, HW), lambda i: (i, 0)),
        ),
        compiler_params=pltpu.CompilerParams(
            dimension_semantics=("parallel",),
            vmem_limit_bytes=vmem_bytes,
        ),
    )(s_flat, x_flat)

    return out.reshape(B, C, H, W)


if __name__ == "__main__":
    # Shapes from the PyTorch module's forward: x249 (1, 768, 14, 14),
    # x253 (1, 768, 1, 1).  Small enough to run as-is.
    B, C, H, W = 1, 768, 14, 14
    key = jax.random.PRNGKey(0)
    k1, k2 = jax.random.split(key)
    x249 = jax.random.normal(k1, (B, C, H, W), dtype=jnp.float32)
    x253 = jax.random.normal(k2, (B, C, 1, 1), dtype=jnp.float32)

    ref = jax.nn.sigmoid(x253) * x249

    # Default tiling (one or few big row tiles at this size).
    out = jax.block_until_ready(sigmoid_mul(x253, x249))
    assert out.shape == (B, C, H, W)
    assert jnp.allclose(out, ref, atol=1e-6, rtol=1e-6)

    # Multi-step pipelined path (evenly dividing tiles).
    out_tiled = jax.block_until_ready(sigmoid_mul(x253, x249, tile_rows=64))
    assert jnp.allclose(out_tiled, ref, atol=1e-6, rtol=1e-6)

    # Partial last block path (tile does not divide B*C; edge writes masked).
    out_edge = jax.block_until_ready(sigmoid_mul(x253, x249, tile_rows=80))
    assert jnp.allclose(out_edge, ref, atol=1e-6, rtol=1e-6)

    print("KERNEL_OK")
</pallas_src>

<mosaic_0001>
module attributes {stable_mosaic.version = 11 : i64} {
  func.func @_sigmoid_mul_kernel(%arg0: i32, %arg1: memref<768x1xf32, #tpu.memory_space<vmem>>, %arg2: memref<768x196xf32, #tpu.memory_space<vmem>>, %arg3: memref<768x196xf32, #tpu.memory_space<vmem>>) attributes {dimension_semantics = [#tpu.dimension_semantics<parallel>], iteration_bounds = array<i64: 1>, scalar_prefetch = 0 : i64, scratch_operands = 0 : i64, tpu.core_type = #tpu.core_type<tc>, window_params = [{transform_indices = @transform_0, window_bounds = array<i64: 768, 1>}, {transform_indices = @transform_1, window_bounds = array<i64: 768, 196>}, {transform_indices = @transform_2, window_bounds = array<i64: 768, 196>}]} {
    %c0 = arith.constant 0 : index
    %c0_0 = arith.constant 0 : index
    %0 = vector.load %arg1[%c0, %c0_0] : memref<768x1xf32, #tpu.memory_space<vmem>>, vector<768x1xf32>
    %1 = arith.negf %0 : vector<768x1xf32>
    %2 = math.exp %1 : vector<768x1xf32>
    %cst = arith.constant 1.000000e+00 : f32
    %3 = vector.broadcast %cst : f32 to vector<768x1xf32>
    %4 = arith.addf %3, %2 : vector<768x1xf32>
    %5 = arith.divf %3, %4 : vector<768x1xf32>
    %c0_1 = arith.constant 0 : index
    %c0_2 = arith.constant 0 : index
    %6 = vector.load %arg2[%c0_1, %c0_2] : memref<768x196xf32, #tpu.memory_space<vmem>>, vector<768x196xf32>
    %7 = vector.broadcast %5 : vector<768x1xf32> to vector<768x196xf32>
    %8 = arith.mulf %6, %7 : vector<768x196xf32>
    %c0_3 = arith.constant 0 : index
    %c0_4 = arith.constant 0 : index
    %9 = vector.load %arg3[%c0_3, %c0_4] : memref<768x196xf32, #tpu.memory_space<vmem>>, vector<768x196xf32>
    tpu.vector_store %arg3[%c0_3, %c0_4], %8 {strides = array<i32>} : memref<768x196xf32, #tpu.memory_space<vmem>>, vector<768x196xf32>,
    return
  }
  func.func @transform_0(%arg0: i32) -> (i32, i32) {
    %c0_i32 = arith.constant 0 : i32
    %c0_i32_0 = arith.constant 0 : i32
    return %arg0, %c0_i32 : i32, i32
  }
  func.func @transform_1(%arg0: i32) -> (i32, i32) {
    %c0_i32 = arith.constant 0 : i32
    %c0_i32_0 = arith.constant 0 : i32
    return %arg0, %c0_i32 : i32, i32
  }
  func.func @transform_2(%arg0: i32) -> (i32, i32) {
    %c0_i32 = arith.constant 0 : i32
    %c0_i32_0 = arith.constant 0 : i32
    return %arg0, %c0_i32 : i32, i32
  }
}

</mosaic_0001>

<bundles_post_ra>
// kernel: tpu_custom_call.1
= control target key start
LH: loop header
LB: loop body
LE: loop exit
PB: predicated region body
PF: predicated region fallthrough
CT: control target
= control target key end

     0   :  { %v2227_v0 = vmov 0   ;;  %vm1548_vm0 = vcmask 556032   ;;  %s3794_s0 = inlined_call_operand.vmem [shape: f32[768,1], index: 0, kind: input, shape index: {}]   ;;  %s3795_s1 = inlined_call_operand.vmem [shape: f32[768,196], index: 1, kind: input, shape index: {}]   ;;  %s3796_s2 = inlined_call_operand.vmem [shape: f32[768,196], index: 2, kind: output, shape index: {}]  }
   0x1   :  { %1842 = vset.pattern.permute.xlu1 %v2227_v0  ;;  %1841 = vset.pattern.permute.xlu0 %v2227_v0  ;;  %v13_v1 = vld [vmem:[%s3794_s0 + $0x10] sm:$0xff]  ;;  %v11_v2 = vld [vmem:[%s3794_s0] sm:$0xff]  ;;  %v14_v3 = vld [vmem:[%s3794_s0 + $0x18] sm:$0xff] }
   0x2   :  { %v1746_v4 = vmul.f32 -1.442695, %v13_v1  ;;  %v1744_v5 = vmul.f32 -1.442695, %v11_v2  ;;  %v1747_v6 = vmul.f32 -1.442695, %v14_v3 }
   0x3   :  { %v12_v7 = vld [vmem:[%s3794_s0 + $0x8] sm:$0xff]  ;;  %v15_v9 = vld [vmem:[%s3794_s0 + $0x20] sm:$0xff]  ;;  %v18_v13 = vld [vmem:[%s3794_s0 + $0x38] sm:$0xff] }
   0x4   :  { %v16_v8 = vld [vmem:[%s3794_s0 + $0x28] sm:$0xff]  ;;  %1843 = vpow2.f32 %v1746_v4  ;;  %v1745_v10 = vmul.f32 -1.442695, %v12_v7  ;;  %v1748_v12 = vmul.f32 -1.442695, %v15_v9  ;;  %v17_v14 = vld [vmem:[%s3794_s0 + $0x30] sm:$0xff] }
   0x5   :  { %v1749_v11 = vmul.f32 -1.442695, %v16_v8  ;;  %1845 = vpow2.f32 %v1744_v5  ;;  %v20_v15 = vld [vmem:[%s3794_s0 + $0x48] sm:$0xff]  ;;  %v1751_v16 = vmul.f32 -1.442695, %v18_v13  ;;  %v19_v18 = vld [vmem:[%s3794_s0 + $0x40] sm:$0xff] }
   0x6   :  { %1847 = vpow2.f32 %v1747_v6  ;;  %v1750_v17 = vmul.f32 -1.442695, %v17_v14  ;;  %v22_v19 = vld [vmem:[%s3794_s0 + $0x58] sm:$0xff]  ;;  %v1753_v20 = vmul.f32 -1.442695, %v20_v15  ;;  %v21_v21 = vld [vmem:[%s3794_s0 + $0x50] sm:$0xff] }
   0x7   :  { %1849 = vpow2.f32 %v1745_v10  ;;  %v1752_v22 = vmul.f32 -1.442695, %v19_v18  ;;  %v24_v23 = vld [vmem:[%s3794_s0 + $0x68] sm:$0xff]  ;;  %v1755_v24 = vmul.f32 -1.442695, %v22_v19  ;;  %v23_v46 = vld [vmem:[%s3794_s0 + $0x60] sm:$0xff] }
   0x8   :  { %1851 = vpow2.f32 %v1749_v11  ;;  %v1754_v25 = vmul.f32 -1.442695, %v21_v21  ;;  %v1757_v26 = vmul.f32 -1.442695, %v24_v23  ;;  %v26_v49 = vld [vmem:[%s3794_s0 + $0x78] sm:$0xff]  ;;  %v25_v52 = vld [vmem:[%s3794_s0 + $0x70] sm:$0xff] }
   0x9   :  { %1853 = vpow2.f32 %v1748_v12  ;;  %v1756_v55 = vmul.f32 -1.442695, %v23_v46  ;;  %v28_v56 = vld [vmem:[%s3794_s0 + $0x88] sm:$0xff]  ;;  %v1759_v59 = vmul.f32 -1.442695, %v26_v49  ;;  %v27_v60 = vld [vmem:[%s3794_s0 + $0x80] sm:$0xff] }
   0xa   :  { %1855 = vpow2.f32 %v1751_v16  ;;  %v1758_v62 = vmul.f32 -1.442695, %v25_v52  ;;  %v30_v63 = vld [vmem:[%s3794_s0 + $0x98] sm:$0xff]  ;;  %v1761_v1 = vmul.f32 -1.442695, %v28_v56  ;;  %v29_v2 = vld [vmem:[%s3794_s0 + $0x90] sm:$0xff] }
   0xb   :  { %1857 = vpow2.f32 %v1750_v17  ;;  %v1760_v4 = vmul.f32 -1.442695, %v27_v60  ;;  %v32_v5 = vld [vmem:[%s3794_s0 + $0xa8] sm:$0xff]  ;;  %v1763_v7 = vmul.f32 -1.442695, %v30_v63  ;;  %v31_v8 = vld [vmem:[%s3794_s0 + $0xa0] sm:$0xff] }
   0xc   :  { %1859 = vpow2.f32 %v1753_v20  ;;  %v1762_v10 = vmul.f32 -1.442695, %v29_v2  ;;  %v34_v11 = vld [vmem:[%s3794_s0 + $0xb8] sm:$0xff]  ;;  %v1765_v13 = vmul.f32 -1.442695, %v32_v5  ;;  %v33_v14 = vld [vmem:[%s3794_s0 + $0xb0] sm:$0xff] }
   0xd   :  { %1861 = vpow2.f32 %v1752_v22  ;;  %v1764_v16 = vmul.f32 -1.442695, %v31_v8  ;;  %v36_v17 = vld [vmem:[%s3794_s0 + $0xc8] sm:$0xff]  ;;  %v1767_v19 = vmul.f32 -1.442695, %v34_v11  ;;  %v35_v20 = vld [vmem:[%s3794_s0 + $0xc0] sm:$0xff] }
   0xe   :  { %v1844_v27 = vpop.eup %1843  ;;  %1863 = vpow2.f32 %v1755_v24  ;;  %v1766_v22 = vmul.f32 -1.442695, %v33_v14  ;;  %v1769_v24 = vmul.f32 -1.442695, %v36_v17 }
   0xf   :  { %v1846_v28 = vpop.eup %1845  ;;  %v397_v29 = vadd.f32 1.0, %v1844_v27  ;;  %1865 = vpow2.f32 %v1754_v25 }
  0x10   :  { %v1848_v30 = vpop.eup %1847  ;;  %v395_v31 = vadd.f32 1.0, %v1846_v28  ;;  %1867 = vpow2.f32 %v1757_v26  ;;  %v1768_v26 = vmul.f32 -1.442695, %v35_v20 }
  0x11   :  { %v1850_v32 = vpop.eup %1849  ;;  %1869 = vrcp.f32 %v397_v29  ;;  %v398_v33 = vadd.f32 1.0, %v1848_v30 }
  0x12   :  { %v1852_v34 = vpop.eup %1851  ;;  %1871 = vrcp.f32 %v395_v31  ;;  %v396_v35 = vadd.f32 1.0, %v1850_v32 }
  0x13   :  { %v1854_v36 = vpop.eup %1853  ;;  %1873 = vrcp.f32 %v398_v33  ;;  %v400_v37 = vadd.f32 1.0, %v1852_v34 }
  0x14   :  { %v1856_v38 = vpop.eup %1855  ;;  %1875 = vrcp.f32 %v396_v35  ;;  %v399_v39 = vadd.f32 1.0, %v1854_v36 }
  0x15   :  { %v1858_v40 = vpop.eup %1857  ;;  %1877 = vrcp.f32 %v400_v37  ;;  %v402_v41 = vadd.f32 1.0, %v1856_v38 }
  0x16   :  { %v1860_v42 = vpop.eup %1859  ;;  %1879 = vrcp.f32 %v399_v39  ;;  %v401_v43 = vadd.f32 1.0, %v1858_v40 }
  0x17   :  { %v1862_v44 = vpop.eup %1861  ;;  %1881 = vrcp.f32 %v402_v41  ;;  %v404_v45 = vadd.f32 1.0, %v1860_v42 }
  0x18   :  { %v1864_v47 = vpop.eup %1863  ;;  %1883 = vrcp.f32 %v401_v43  ;;  %v403_v48 = vadd.f32 1.0, %v1862_v44 }
  0x19   :  { %v1866_v50 = vpop.eup %1865  ;;  %1885 = vrcp.f32 %v404_v45  ;;  %v406_v51 = vadd.f32 1.0, %v1864_v47  ;;  %v38_v47 = vld [vmem:[%s3794_s0 + $0xd8] sm:$0xff] }
  0x1a   :  { %v1868_v53 = vpop.eup %1867  ;;  %1887 = vrcp.f32 %v403_v48  ;;  %v405_v54 = vadd.f32 1.0, %v1866_v50  ;;  %v37_v50 = vld [vmem:[%s3794_s0 + $0xd0] sm:$0xff]  ;;  %v1771_v56 = vmul.f32 -1.442695, %v38_v47 }
  0x1b   :  { %v1870_v57 = vpop.eup %1869  ;;  %1889 = vrcp.f32 %v406_v51  ;;  %v408_v58 = vadd.f32 1.0, %v1868_v53  ;;  %v40_v53 = vld [vmem:[%s3794_s0 + $0xe8] sm:$0xff]  ;;  %v1770_v60 = vmul.f32 -1.442695, %v37_v50 }
  0x1c   :  { %v1872_v61 = vpop.eup %1871  ;;  %887 = vperm.xlu1 %1842, %v1870_v57   ;;  %1891 = vrcp.f32 %v405_v54  ;;  %v39_v57 = vld [vmem:[%s3794_s0 + $0xe0] sm:$0xff]  ;;  %v1773_v63 = vmul.f32 -1.442695, %v40_v53 }
  0x1d   :  { %v1874_v0 = vpop.eup %1873  ;;  %877 = vperm.xlu0 %1841, %v1872_v61   ;;  %1893 = vrcp.f32 %v408_v58  ;;  %v42_v61 = vld [vmem:[%s3794_s0 + $0xf8] sm:$0xff]  ;;  %v1772_v2 = vmul.f32 -1.442695, %v39_v57 }
  0x1e   :  { %v1876_v3 = vpop.eup %1875  ;;  %1895 = vpow2.f32 %v1756_v55  ;;  %v1775_v5 = vmul.f32 -1.442695, %v42_v61 }
  0x1f   :  { %v1878_v6 = vpop.eup %1877  ;;  %1897 = vpow2.f32 %v1759_v59 }
  0x20   :  { %v1880_v9 = vpop.eup %1879  ;;  %892 = vperm.xlu1 %1842, %v1874_v0   ;;  %1899 = vpow2.f32 %v1758_v62  ;;  %v41_v0 = vld [vmem:[%s3794_s0 + $0xf0] sm:$0xff] }
  0x21   :  { %v1882_v12 = vpop.eup %1881  ;;  %882 = vperm.xlu0 %1841, %v1876_v3   ;;  %1901 = vpow2.f32 %v1761_v1  ;;  %v44_v3 = vld [vmem:[%s3794_s0 + $0x108] sm:$0xff]  ;;  %v1774_v8 = vmul.f32 -1.442695, %v41_v0 }
  0x22   :  { %v1884_v15 = vpop.eup %1883  ;;  %1903 = vpow2.f32 %v1760_v4  ;;  %v1777_v11 = vmul.f32 -1.442695, %v44_v3 }
  0x23   :  { %v1886_v18 = vpop.eup %1885  ;;  %1905 = vpow2.f32 %v1763_v7 }
  0x24   :  { %v1888_v21 = vpop.eup %1887  ;;  %902 = vperm.xlu1 %1842, %v1878_v6   ;;  %1907 = vpow2.f32 %v1762_v10  ;;  %v43_v6 = vld [vmem:[%s3794_s0 + $0x100] sm:$0xff] }
  0x25   :  { %v1890_v23 = vpop.eup %1889  ;;  %897 = vperm.xlu0 %1841, %v1880_v9   ;;  %1909 = vpow2.f32 %v1765_v13  ;;  %v46_v9 = vld [vmem:[%s3794_s0 + $0x118] sm:$0xff]  ;;  %v1776_v14 = vmul.f32 -1.442695, %v43_v6 }
  0x26   :  { %v1892_v25 = vpop.eup %1891  ;;  %1911 = vpow2.f32 %v1764_v16  ;;  %v1779_v17 = vmul.f32 -1.442695, %v46_v9 }
  0x27   :  { %v1894_v27 = vpop.eup %1893  ;;  %1913 = vpow2.f32 %v1767_v19 }
  0x28   :  { %v1896_v28 = vpop.eup %1895  ;;  %912 = vperm.xlu1 %1842, %v1882_v12   ;;  %1915 = vpow2.f32 %v1766_v22  ;;  %v45_v12 = vld [vmem:[%s3794_s0 + $0x110] sm:$0xff] }
  0x29   :  { %v1898_v29 = vpop.eup %1897  ;;  %907 = vperm.xlu0 %1841, %v1884_v15   ;;  %v407_v30 = vadd.f32 1.0, %v1896_v28  ;;  %1917 = vpow2.f32 %v1769_v24  ;;  %v48_v15 = vld [vmem:[%s3794_s0 + $0x128] sm:$0xff]  ;;  %v1778_v20 = vmul.f32 -1.442695, %v45_v12 }
  0x2a   :  { %v1900_v31 = vpop.eup %1899  ;;  %v410_v32 = vadd.f32 1.0, %v1898_v29  ;;  %1919 = vpow2.f32 %v1768_v26 }
  0x2b   :  { %v1902_v33 = vpop.eup %1901  ;;  %1921 = vrcp.f32 %v407_v30  ;;  %v409_v34 = vadd.f32 1.0, %v1900_v31 }
  0x2c   :  { %v1904_v35 = vpop.eup %1903  ;;  %922 = vperm.xlu1 %1842, %v1886_v18   ;;  %1923 = vrcp.f32 %v410_v32  ;;  %v412_v36 = vadd.f32 1.0, %v1902_v33  ;;  %v47_v18 = vld [vmem:[%s3794_s0 + $0x120] sm:$0xff] }
  0x2d   :  { %v1906_v37 = vpop.eup %1905  ;;  %917 = vperm.xlu0 %1841, %v1888_v21   ;;  %1925 = vrcp.f32 %v409_v34  ;;  %v411_v38 = vadd.f32 1.0, %v1904_v35  ;;  %v50_v21 = vld [vmem:[%s3794_s0 + $0x138] sm:$0xff] }
  0x2e   :  { %v1908_v39 = vpop.eup %1907  ;;  %1927 = vrcp.f32 %v412_v36  ;;  %v414_v40 = vadd.f32 1.0, %v1906_v37 }
  0x2f   :  { %v1910_v41 = vpop.eup %1909  ;;  %1929 = vrcp.f32 %v411_v38  ;;  %v413_v42 = vadd.f32 1.0, %v1908_v39 }
  0x30   :  { %v1912_v43 = vpop.eup %1911  ;;  %932 = vperm.xlu1 %1842, %v1890_v23   ;;  %1931 = vrcp.f32 %v414_v40  ;;  %v416_v44 = vadd.f32 1.0, %v1910_v41  ;;  %v1781_v23 = vmul.f32 -1.442695, %v48_v15 }
  0x31   :  { %v1914_v45 = vpop.eup %1913  ;;  %927 = vperm.xlu0 %1841, %v1892_v25   ;;  %1933 = vrcp.f32 %v413_v42  ;;  %v415_v46 = vadd.f32 1.0, %v1912_v43  ;;  %v1780_v25 = vmul.f32 -1.442695, %v47_v18 }
  0x32   :  { %v1916_v48 = vpop.eup %1915  ;;  %1935 = vrcp.f32 %v416_v44  ;;  %v418_v49 = vadd.f32 1.0, %v1914_v45 }
  0x33   :  { %v1918_v51 = vpop.eup %1917  ;;  %1937 = vrcp.f32 %v415_v46  ;;  %v417_v52 = vadd.f32 1.0, %v1916_v48  ;;  %v49_v48 = vld [vmem:[%s3794_s0 + $0x130] sm:$0xff] }
  0x34   :  { %v1920_v54 = vpop.eup %1919  ;;  %942 = vperm.xlu1 %1842, %v1894_v27   ;;  %1939 = vrcp.f32 %v418_v49  ;;  %v420_v55 = vadd.f32 1.0, %v1918_v51  ;;  %v1783_v27 = vmul.f32 -1.442695, %v50_v21  ;;  %v52_v51 = vld [vmem:[%s3794_s0 + $0x148] sm:$0xff]  ;;  %v1782_v57 = vmul.f32 -1.442695, %v49_v48 }
  0x35   :  { %v1922_v58 = vpop.eup %1921  ;;  %1941 = vrcp.f32 %v417_v52  ;;  %v419_v59 = vadd.f32 1.0, %v1920_v54  ;;  %v51_v54 = vld [vmem:[%s3794_s0 + $0x140] sm:$0xff]  ;;  %v1785_v61 = vmul.f32 -1.442695, %v52_v51 }
  0x36   :  { %v1924_v62 = vpop.eup %1923  ;;  %937 = vperm.xlu0 %1841, %v1922_v58   ;;  %1943 = vrcp.f32 %v420_v55  ;;  %v54_v58 = vld [vmem:[%s3794_s0 + $0x158] sm:$0xff]  ;;  %v1784_v0 = vmul.f32 -1.442695, %v51_v54 }
  0x37   :  { %v1926_v1 = vpop.eup %1925  ;;  %1945 = vrcp.f32 %v419_v59  ;;  %v1787_v3 = vmul.f32 -1.442695, %v54_v58 }
  0x38   :  { %v1928_v4 = vpop.eup %1927  ;;  %952 = vperm.xlu1 %1842, %v1924_v62   ;;  %1947 = vpow2.f32 %v1771_v56  ;;  %v53_v62 = vld [vmem:[%s3794_s0 + $0x150] sm:$0xff] }
  0x39   :  { %v1930_v7 = vpop.eup %1929  ;;  %1949 = vpow2.f32 %v1770_v60  ;;  %v1786_v6 = vmul.f32 -1.442695, %v53_v62 }
  0x3a   :  { %v1932_v10 = vpop.eup %1931  ;;  %947 = vperm.xlu0 %1841, %v1926_v1   ;;  %1951 = vpow2.f32 %v1773_v63  ;;  %v56_v1 = vld [vmem:[%s3794_s0 + $0x168] sm:$0xff] }
  0x3b   :  { %v1934_v13 = vpop.eup %1933  ;;  %1953 = vpow2.f32 %v1772_v2  ;;  %v1789_v9 = vmul.f32 -1.442695, %v56_v1 }
  0x3c   :  { %v1936_v16 = vpop.eup %1935  ;;  %962 = vperm.xlu1 %1842, %v1928_v4   ;;  %1955 = vpow2.f32 %v1775_v5  ;;  %v55_v4 = vld [vmem:[%s3794_s0 + $0x160] sm:$0xff] }
  0x3d   :  { %v1938_v19 = vpop.eup %1937  ;;  %1957 = vpow2.f32 %v1774_v8  ;;  %v1788_v12 = vmul.f32 -1.442695, %v55_v4 }
  0x3e   :  { %v1940_v22 = vpop.eup %1939  ;;  %957 = vperm.xlu0 %1841, %v1930_v7   ;;  %1959 = vpow2.f32 %v1777_v11  ;;  %v58_v7 = vld [vmem:[%s3794_s0 + $0x178] sm:$0xff] }
  0x3f   :  { %v1942_v24 = vpop.eup %1941  ;;  %1961 = vpow2.f32 %v1776_v14  ;;  %v1791_v15 = vmul.f32 -1.442695, %v58_v7 }
  0x40   :  { %v1944_v26 = vpop.eup %1943  ;;  %972 = vperm.xlu1 %1842, %v1932_v10   ;;  %1963 = vpow2.f32 %v1779_v17  ;;  %v57_v10 = vld [vmem:[%s3794_s0 + $0x170] sm:$0xff] }
  0x41   :  { %v1946_v28 = vpop.eup %1945  ;;  %1965 = vpow2.f32 %v1778_v20  ;;  %v1790_v18 = vmul.f32 -1.442695, %v57_v10 }
  0x42   :  { %v1948_v29 = vpop.eup %1947  ;;  %967 = vperm.xlu0 %1841, %v1934_v13   ;;  %1967 = vpow2.f32 %v1781_v23  ;;  %v60_v13 = vld [vmem:[%s3794_s0 + $0x188] sm:$0xff] }
  0x43   :  { %v1950_v30 = vpop.eup %1949  ;;  %v422_v31 = vadd.f32 1.0, %v1948_v29  ;;  %1969 = vpow2.f32 %v1780_v25  ;;  %v1793_v21 = vmul.f32 -1.442695, %v60_v13 }
  0x44   :  { %v1952_v32 = vpop.eup %1951  ;;  %982 = vperm.xlu1 %1842, %v1936_v16   ;;  %v421_v33 = vadd.f32 1.0, %v1950_v30  ;;  %1971 = vpow2.f32 %v1783_v27  ;;  %v59_v16 = vld [vmem:[%s3794_s0 + $0x180] sm:$0xff] }
  0x45   :  { %v1954_v34 = vpop.eup %1953  ;;  %1973 = vrcp.f32 %v422_v31  ;;  %v424_v35 = vadd.f32 1.0, %v1952_v32 }
  0x46   :  { %v1956_v36 = vpop.eup %1955  ;;  %977 = vperm.xlu0 %1841, %v1938_v19   ;;  %1975 = vrcp.f32 %v421_v33  ;;  %v423_v37 = vadd.f32 1.0, %v1954_v34  ;;  %v62_v19 = vld [vmem:[%s3794_s0 + $0x198] sm:$0xff] }
  0x47   :  { %v1958_v38 = vpop.eup %1957  ;;  %1977 = vrcp.f32 %v424_v35  ;;  %v426_v39 = vadd.f32 1.0, %v1956_v36 }
  0x48   :  { %v1960_v40 = vpop.eup %1959  ;;  %992 = vperm.xlu1 %1842, %v1940_v22   ;;  %1979 = vrcp.f32 %v423_v37  ;;  %v425_v41 = vadd.f32 1.0, %v1958_v38  ;;  %v61_v22 = vld [vmem:[%s3794_s0 + $0x190] sm:$0xff] }
  0x49   :  { %v1962_v42 = vpop.eup %1961  ;;  %1981 = vrcp.f32 %v426_v39  ;;  %v428_v43 = vadd.f32 1.0, %v1960_v40 }
  0x4a   :  { %v1964_v44 = vpop.eup %1963  ;;  %987 = vperm.xlu0 %1841, %v1942_v24   ;;  %1983 = vrcp.f32 %v425_v41  ;;  %v427_v45 = vadd.f32 1.0, %v1962_v42  ;;  %v1792_v24 = vmul.f32 -1.442695, %v59_v16 }
  0x4b   :  { %v1966_v46 = vpop.eup %1965  ;;  %1985 = vrcp.f32 %v428_v43  ;;  %v430_v47 = vadd.f32 1.0, %v1964_v44 }
  0x4c   :  { %v1968_v49 = vpop.eup %1967  ;;  %1002 = vperm.xlu1 %1842, %v1944_v26   ;;  %1987 = vrcp.f32 %v427_v45  ;;  %v429_v50 = vadd.f32 1.0, %v1966_v46  ;;  %v1795_v26 = vmul.f32 -1.442695, %v62_v19 }
  0x4d   :  { %v1970_v52 = vpop.eup %1969  ;;  %1989 = vrcp.f32 %v430_v47  ;;  %v432_v53 = vadd.f32 1.0, %v1968_v49  ;;  %v64_v49 = vld [vmem:[%s3794_s0 + $0x1a8] sm:$0xff] }
  0x4e   :  { %v1972_v55 = vpop.eup %1971  ;;  %997 = vperm.xlu0 %1841, %v1946_v28   ;;  %1991 = vrcp.f32 %v429_v50  ;;  %v431_v56 = vadd.f32 1.0, %v1970_v52  ;;  %v1794_v28 = vmul.f32 -1.442695, %v61_v22  ;;  %v63_v52 = vld [vmem:[%s3794_s0 + $0x1a0] sm:$0xff]  ;;  %v1797_v58 = vmul.f32 -1.442695, %v64_v49 }
  0x4f   :  { %v1974_v59 = vpop.eup %1973  ;;  %1993 = vrcp.f32 %v432_v53  ;;  %v434_v60 = vadd.f32 1.0, %v1972_v55  ;;  %v66_v55 = vld [vmem:[%s3794_s0 + $0x1b8] sm:$0xff]  ;;  %v1796_v62 = vmul.f32 -1.442695, %v63_v52 }
  0x50   :  { %v1976_v63 = vpop.eup %1975  ;;  %1012 = vperm.xlu1 %1842, %v1974_v59   ;;  %1995 = vrcp.f32 %v431_v56  ;;  %v65_v59 = vld [vmem:[%s3794_s0 + $0x1b0] sm:$0xff]  ;;  %v1799_v1 = vmul.f32 -1.442695, %v66_v55 }
  0x51   :  { %v1978_v2 = vpop.eup %1977  ;;  %1997 = vrcp.f32 %v434_v60  ;;  %v1798_v4 = vmul.f32 -1.442695, %v65_v59 }
  0x52   :  { %v1980_v5 = vpop.eup %1979  ;;  %1007 = vperm.xlu0 %1841, %v1976_v63   ;;  %1999 = vpow2.f32 %v1782_v57  ;;  %v68_v63 = vld [vmem:[%s3794_s0 + $0x1c8] sm:$0xff] }
  0x53   :  { %v1982_v8 = vpop.eup %1981  ;;  %2001 = vpow2.f32 %v1785_v61  ;;  %v1801_v7 = vmul.f32 -1.442695, %v68_v63 }
  0x54   :  { %v1984_v11 = vpop.eup %1983  ;;  %1022 = vperm.xlu1 %1842, %v1978_v2   ;;  %2003 = vpow2.f32 %v1784_v0  ;;  %v67_v2 = vld [vmem:[%s3794_s0 + $0x1c0] sm:$0xff] }
  0x55   :  { %v1986_v14 = vpop.eup %1985  ;;  %2005 = vpow2.f32 %v1787_v3  ;;  %v1800_v10 = vmul.f32 -1.442695, %v67_v2 }
  0x56   :  { %v1988_v17 = vpop.eup %1987  ;;  %1017 = vperm.xlu0 %1841, %v1980_v5   ;;  %2007 = vpow2.f32 %v1786_v6  ;;  %v70_v5 = vld [vmem:[%s3794_s0 + $0x1d8] sm:$0xff] }
  0x57   :  { %v1990_v20 = vpop.eup %1989  ;;  %2009 = vpow2.f32 %v1789_v9  ;;  %v1803_v13 = vmul.f32 -1.442695, %v70_v5 }
  0x58   :  { %v1992_v23 = vpop.eup %1991  ;;  %1032 = vperm.xlu1 %1842, %v1982_v8   ;;  %2011 = vpow2.f32 %v1788_v12  ;;  %v69_v8 = vld [vmem:[%s3794_s0 + $0x1d0] sm:$0xff] }
  0x59   :  { %v1994_v25 = vpop.eup %1993  ;;  %2013 = vpow2.f32 %v1791_v15  ;;  %v1802_v16 = vmul.f32 -1.442695, %v69_v8 }
  0x5a   :  { %v1996_v27 = vpop.eup %1995  ;;  %1027 = vperm.xlu0 %1841, %v1984_v11   ;;  %2015 = vpow2.f32 %v1790_v18  ;;  %v72_v11 = vld [vmem:[%s3794_s0 + $0x1e8] sm:$0xff] }
  0x5b   :  { %v1998_v29 = vpop.eup %1997  ;;  %2017 = vpow2.f32 %v1793_v21  ;;  %v1805_v19 = vmul.f32 -1.442695, %v72_v11 }
  0x5c   :  { %v2000_v30 = vpop.eup %1999  ;;  %1042 = vperm.xlu1 %1842, %v1986_v14   ;;  %2019 = vpow2.f32 %v1792_v24  ;;  %v71_v14 = vld [vmem:[%s3794_s0 + $0x1e0] sm:$0xff] }
  0x5d   :  { %v2002_v31 = vpop.eup %2001  ;;  %v433_v32 = vadd.f32 1.0, %v2000_v30  ;;  %2021 = vpow2.f32 %v1795_v26  ;;  %v1804_v22 = vmul.f32 -1.442695, %v71_v14 }
  0x5e   :  { %v2004_v33 = vpop.eup %2003  ;;  %1037 = vperm.xlu0 %1841, %v1988_v17   ;;  %v436_v34 = vadd.f32 1.0, %v2002_v31  ;;  %2023 = vpow2.f32 %v1794_v28  ;;  %v74_v17 = vld [vmem:[%s3794_s0 + $0x1f8] sm:$0xff] }
  0x5f   :  { %v2006_v35 = vpop.eup %2005  ;;  %2025 = vrcp.f32 %v433_v32  ;;  %v435_v36 = vadd.f32 1.0, %v2004_v33 }
  0x60   :  { %v2008_v37 = vpop.eup %2007  ;;  %1052 = vperm.xlu1 %1842, %v1990_v20   ;;  %2027 = vrcp.f32 %v436_v34  ;;  %v438_v38 = vadd.f32 1.0, %v2006_v35  ;;  %v73_v20 = vld [vmem:[%s3794_s0 + $0x1f0] sm:$0xff] }
  0x61   :  { %v2010_v39 = vpop.eup %2009  ;;  %2029 = vrcp.f32 %v435_v36  ;;  %v437_v40 = vadd.f32 1.0, %v2008_v37 }
  0x62   :  { %v2012_v41 = vpop.eup %2011  ;;  %1047 = vperm.xlu0 %1841, %v1992_v23   ;;  %2031 = vrcp.f32 %v438_v38  ;;  %v440_v42 = vadd.f32 1.0, %v2010_v39  ;;  %v76_v23 = vld [vmem:[%s3794_s0 + $0x208] sm:$0xff] }
  0x63   :  { %v2014_v43 = vpop.eup %2013  ;;  %2033 = vrcp.f32 %v437_v40  ;;  %v439_v44 = vadd.f32 1.0, %v2012_v41 }
  0x64   :  { %v2016_v45 = vpop.eup %2015  ;;  %1062 = vperm.xlu1 %1842, %v1994_v25   ;;  %2035 = vrcp.f32 %v440_v42  ;;  %v442_v46 = vadd.f32 1.0, %v2014_v43  ;;  %v1807_v25 = vmul.f32 -1.442695, %v74_v17 }
  0x65   :  { %v2018_v47 = vpop.eup %2017  ;;  %2037 = vrcp.f32 %v439_v44  ;;  %v441_v48 = vadd.f32 1.0, %v2016_v45 }
  0x66   :  { %v2020_v50 = vpop.eup %2019  ;;  %1057 = vperm.xlu0 %1841, %v1996_v27   ;;  %2039 = vrcp.f32 %v442_v46  ;;  %v444_v51 = vadd.f32 1.0, %v2018_v47  ;;  %v1806_v27 = vmul.f32 -1.442695, %v73_v20 }
  0x67   :  { %v2022_v53 = vpop.eup %2021  ;;  %2041 = vrcp.f32 %v441_v48  ;;  %v443_v54 = vadd.f32 1.0, %v2020_v50  ;;  %v75_v50 = vld [vmem:[%s3794_s0 + $0x200] sm:$0xff] }
  0x68   :  { %v2024_v56 = vpop.eup %2023  ;;  %1072 = vperm.xlu1 %1842, %v1998_v29   ;;  %2043 = vrcp.f32 %v444_v51  ;;  %v446_v57 = vadd.f32 1.0, %v2022_v53  ;;  %v1809_v29 = vmul.f32 -1.442695, %v76_v23  ;;  %v78_v53 = vld [vmem:[%s3794_s0 + $0x218] sm:$0xff]  ;;  %v1808_v59 = vmul.f32 -1.442695, %v75_v50 }
  0x69   :  { %v2026_v60 = vpop.eup %2025  ;;  %2045 = vrcp.f32 %v443_v54  ;;  %v445_v61 = vadd.f32 1.0, %v2024_v56  ;;  %v77_v56 = vld [vmem:[%s3794_s0 + $0x210] sm:$0xff]  ;;  %v1811_v63 = vmul.f32 -1.442695, %v78_v53  ;;  %v688_v53 = vld [vmem:[%s3795_s1 + $0x28] sm:$0xff] }
  0x6a   :  { %v2028_v0 = vpop.eup %2027  ;;  %1067 = vperm.xlu0 %1841, %v2026_v60   ;;  %2047 = vrcp.f32 %v446_v57  ;;  %v80_v60 = vld [vmem:[%s3794_s0 + $0x228] sm:$0xff]  ;;  %v1810_v2 = vmul.f32 -1.442695, %v77_v56  ;;  %v89_v50 = vld [vmem:[%s3794_s0 + $0x270] sm:$0xff]  ;;  %v683_v56 = vld [vmem:[%s3795_s1] sm:$0xff] }
  0x6b   :  { %v2030_v3 = vpop.eup %2029  ;;  %2049 = vrcp.f32 %v445_v61  ;;  %v1813_v5 = vmul.f32 -1.442695, %v80_v60 }
  0x6c   :  { %v2032_v6 = vpop.eup %2031  ;;  %1082 = vperm.xlu1 %1842, %v2028_v0   ;;  %2051 = vpow2.f32 %v1797_v58  ;;  %v79_v0 = vld [vmem:[%s3794_s0 + $0x220] sm:$0xff] }
  0x6d   :  { %v2034_v9 = vpop.eup %2033  ;;  %2053 = vpow2.f32 %v1796_v62  ;;  %v1812_v8 = vmul.f32 -1.442695, %v79_v0  ;;  %v92_v0 = vld [vmem:[%s3794_s0 + $0x288] sm:$0xff] }
  0x6e   :  { %v2036_v12 = vpop.eup %2035  ;;  %1077 = vperm.xlu0 %1841, %v2030_v3   ;;  %2055 = vpow2.f32 %v1799_v1  ;;  %v82_v3 = vld [vmem:[%s3794_s0 + $0x238] sm:$0xff] }
  0x6f   :  { %v2038_v15 = vpop.eup %2037  ;;  %2057 = vpow2.f32 %v1798_v4  ;;  %v1815_v11 = vmul.f32 -1.442695, %v82_v3 }
  0x70   :  { %v2040_v18 = vpop.eup %2039  ;;  %1092 = vperm.xlu1 %1842, %v2032_v6   ;;  %2059 = vpow2.f32 %v1801_v7  ;;  %v81_v6 = vld [vmem:[%s3794_s0 + $0x230] sm:$0xff] }
  0x71   :  { %v2042_v21 = vpop.eup %2041  ;;  %2061 = vpow2.f32 %v1800_v10  ;;  %v1814_v14 = vmul.f32 -1.442695, %v81_v6  ;;  %v91_v6 = vld [vmem:[%s3794_s0 + $0x280] sm:$0xff] }
  0x72   :  { %v2044_v24 = vpop.eup %2043  ;;  %1087 = vperm.xlu0 %1841, %v2034_v9   ;;  %2063 = vpow2.f32 %v1803_v13  ;;  %v84_v9 = vld [vmem:[%s3794_s0 + $0x248] sm:$0xff] }
  0x73   :  { %v2046_v26 = vpop.eup %2045  ;;  %2065 = vpow2.f32 %v1802_v16  ;;  %v1817_v17 = vmul.f32 -1.442695, %v84_v9 }
  0x74   :  { %v2048_v28 = vpop.eup %2047  ;;  %1102 = vperm.xlu1 %1842, %v2036_v12   ;;  %2067 = vpow2.f32 %v1805_v19  ;;  %v83_v12 = vld [vmem:[%s3794_s0 + $0x240] sm:$0xff] }
  0x75   :  { %v2050_v30 = vpop.eup %2049  ;;  %2069 = vpow2.f32 %v1804_v22  ;;  %v1816_v20 = vmul.f32 -1.442695, %v83_v12 }
  0x76   :  { %v2052_v31 = vpop.eup %2051  ;;  %1097 = vperm.xlu0 %1841, %v2038_v15   ;;  %2071 = vpow2.f32 %v1807_v25  ;;  %v86_v15 = vld [vmem:[%s3794_s0 + $0x258] sm:$0xff] }
  0x77   :  { %v2054_v32 = vpop.eup %2053  ;;  %v448_v33 = vadd.f32 1.0, %v2052_v31  ;;  %2073 = vpow2.f32 %v1806_v27  ;;  %v1819_v23 = vmul.f32 -1.442695, %v86_v15  ;;  %v685_v15 = vld [vmem:[%s3795_s1 + $0x10] sm:$0xff] }
  0x78   :  { %v2056_v34 = vpop.eup %2055  ;;  %1112 = vperm.xlu1 %1842, %v2040_v18   ;;  %v447_v35 = vadd.f32 1.0, %v2054_v32  ;;  %2075 = vpow2.f32 %v1809_v29  ;;  %v85_v18 = vld [vmem:[%s3794_s0 + $0x250] sm:$0xff] }
  0x79   :  { %v2058_v36 = vpop.eup %2057  ;;  %2077 = vrcp.f32 %v448_v33  ;;  %v450_v37 = vadd.f32 1.0, %v2056_v34 }
  0x7a   :  { %v2060_v38 = vpop.eup %2059  ;;  %1107 = vperm.xlu0 %1841, %v2042_v21   ;;  %2079 = vrcp.f32 %v447_v35  ;;  %v449_v39 = vadd.f32 1.0, %v2058_v36  ;;  %v88_v21 = vld [vmem:[%s3794_s0 + $0x268] sm:$0xff] }
  0x7b   :  { %v2062_v40 = vpop.eup %2061  ;;  %2081 = vrcp.f32 %v450_v37  ;;  %v452_v41 = vadd.f32 1.0, %v2060_v38 }
  0x7c   :  { %v2064_v42 = vpop.eup %2063  ;;  %1122 = vperm.xlu1 %1842, %v2044_v24   ;;  %2083 = vrcp.f32 %v449_v39  ;;  %v451_v43 = vadd.f32 1.0, %v2062_v40  ;;  %v87_v24 = vld [vmem:[%s3794_s0 + $0x260] sm:$0xff] }
  0x7d   :  { %v2066_v44 = vpop.eup %2065  ;;  %2085 = vrcp.f32 %v452_v41  ;;  %v454_v45 = vadd.f32 1.0, %v2064_v42 }
  0x7e   :  { %v2068_v46 = vpop.eup %2067  ;;  %1117 = vperm.xlu0 %1841, %v2046_v26   ;;  %2087 = vrcp.f32 %v451_v43  ;;  %v453_v47 = vadd.f32 1.0, %v2066_v44  ;;  %v1818_v26 = vmul.f32 -1.442695, %v85_v18  ;;  %v93_v18 = vld [vmem:[%s3794_s0 + $0x290] sm:$0xff] }
  0x7f   :  { %v2070_v48 = vpop.eup %2069  ;;  %2089 = vrcp.f32 %v454_v45  ;;  %v456_v49 = vadd.f32 1.0, %v2068_v46 }
  0x80   :  { %v2072_v51 = vpop.eup %2071  ;;  %1132 = vperm.xlu1 %1842, %v2048_v28   ;;  %2091 = vrcp.f32 %v453_v47  ;;  %v455_v52 = vadd.f32 1.0, %v2070_v48  ;;  %v1821_v28 = vmul.f32 -1.442695, %v88_v21  ;;  %v1824_v21 = vmul.f32 -1.442695, %v91_v6  ;;  %v701_v6 = vld [vmem:[%s3795_s1 + $0x90] sm:$0xff] }
  0x81   :  { %v2074_v54 = vpop.eup %2073  ;;  %2093 = vrcp.f32 %v456_v49  ;;  %v458_v55 = vadd.f32 1.0, %v2072_v51  ;;  %v90_v49 = vld [vmem:[%s3794_s0 + $0x278] sm:$0xff] }
  0x82   :  { %v2076_v57 = vpop.eup %2075  ;;  %1127 = vperm.xlu0 %1841, %v2050_v30   ;;  %2095 = vrcp.f32 %v455_v52  ;;  %v457_v58 = vadd.f32 1.0, %v2074_v54  ;;  %v1820_v30 = vmul.f32 -1.442695, %v87_v24  ;;  %v687_v52 = vld [vmem:[%s3795_s1 + $0x20] sm:$0xff] }
  0x83   :  { %v2078_v61 = vpop.eup %2077  ;;  %2097 = vrcp.f32 %v458_v55  ;;  %v460_v62 = vadd.f32 1.0, %v2076_v57  ;;  %v684_v57 = vld [vmem:[%s3795_s1 + $0x8] sm:$0xff] }
  0x84   :  { %v2080_v1 = vpop.eup %2079  ;;  %1142 = vperm.xlu1 %1842, %v2078_v61   ;;  %2099 = vrcp.f32 %v457_v58 }
  0x85   :  { %v2082_v4 = vpop.eup %2081  ;;  %2101 = vrcp.f32 %v460_v62  ;;  %v1823_v62 = vmul.f32 -1.442695, %v90_v49 }
  0x86   :  { %v2084_v7 = vpop.eup %2083  ;;  %1137 = vperm.xlu0 %1841, %v2080_v1   ;;  %2103 = vpow2.f32 %v1808_v59 }
  0x87   :  { %v2086_v10 = vpop.eup %2085  ;;  %2105 = vpow2.f32 %v1811_v63  ;;  %v1822_v63 = vmul.f32 -1.442695, %v89_v50 }
  0x88   :  { %v2088_v13 = vpop.eup %2087  ;;  %1152 = vperm.xlu1 %1842, %v2082_v4   ;;  %2107 = vpow2.f32 %v1810_v2 }
  0x89   :  { %v2090_v16 = vpop.eup %2089  ;;  %2109 = vpow2.f32 %v1813_v5 }
  0x8a   :  { %v2092_v19 = vpop.eup %2091  ;;  %1147 = vperm.xlu0 %1841, %v2084_v7   ;;  %2111 = vpow2.f32 %v1812_v8 }
  0x8b   :  { %v2094_v22 = vpop.eup %2093  ;;  %2113 = vpow2.f32 %v1815_v11  ;;  %v690_v11 = vld [vmem:[%s3795_s1 + $0x38] sm:$0xff] }
  0x8c   :  { %v2096_v25 = vpop.eup %2095  ;;  %1162 = vperm.xlu1 %1842, %v2086_v10   ;;  %2115 = vpow2.f32 %v1814_v14  ;;  %v689_v10 = vld [vmem:[%s3795_s1 + $0x30] sm:$0xff] }
  0x8d   :  { %v2098_v27 = vpop.eup %2097  ;;  %2117 = vpow2.f32 %v1817_v17  ;;  %v1825_v17 = vmul.f32 -1.442695, %v92_v0 }
  0x8e   :  { %v2100_v29 = vpop.eup %2099  ;;  %1157 = vperm.xlu0 %1841, %v2088_v13   ;;  %2119 = vpow2.f32 %v1816_v20  ;;  %v94_v13 = vld [vmem:[%s3794_s0 + $0x298] sm:$0xff] }
  0x8f   :  { %v2102_v31 = vpop.eup %2101  ;;  %2121 = vpow2.f32 %v1819_v23 }
  0x90   :  { %v2104_v32 = vpop.eup %2103  ;;  %1172 = vperm.xlu1 %1842, %v2090_v16   ;;  %2123 = vpow2.f32 %v1818_v26  ;;  %v686_v16 = vld [vmem:[%s3795_s1 + $0x18] sm:$0xff] }
  0x91   :  { %v2106_v33 = vpop.eup %2105  ;;  %v459_v34 = vadd.f32 1.0, %v2104_v32  ;;  %2125 = vpow2.f32 %v1821_v28  ;;  %v95_v28 = vld [vmem:[%s3794_s0 + $0x2a0] sm:$0xff]  ;;  %v693_v32 = vld [vmem:[%s3795_s1 + $0x50] sm:$0xff] }
  0x92   :  { %v2108_v35 = vpop.eup %2107  ;;  %1167 = vperm.xlu0 %1841, %v2092_v19   ;;  %v462_v36 = vadd.f32 1.0, %v2106_v33  ;;  %2127 = vpow2.f32 %v1820_v30  ;;  %v694_v33 = vld [vmem:[%s3795_s1 + $0x58] sm:$0xff] }
  0x93   :  { %v2110_v37 = vpop.eup %2109  ;;  %2129 = vrcp.f32 %v459_v34  ;;  %v461_v38 = vadd.f32 1.0, %v2108_v35  ;;  %v1826_v34 = vmul.f32 -1.442695, %v93_v18  ;;  %v98_v35 = vld [vmem:[%s3794_s0 + $0x2b8] sm:$0xff] }
  0x94   :  { %v2112_v39 = vpop.eup %2111  ;;  %1182 = vperm.xlu1 %1842, %v2094_v22   ;;  %2131 = vrcp.f32 %v462_v36  ;;  %v464_v40 = vadd.f32 1.0, %v2110_v37  ;;  %v96_v22 = vld [vmem:[%s3794_s0 + $0x2a8] sm:$0xff]  ;;  %v691_v37 = vld [vmem:[%s3795_s1 + $0x40] sm:$0xff] }
  0x95   :  { %v2114_v41 = vpop.eup %2113  ;;  %2133 = vrcp.f32 %v461_v38  ;;  %v463_v42 = vadd.f32 1.0, %v2112_v39  ;;  %v692_v38 = vld [vmem:[%s3795_s1 + $0x48] sm:$0xff]  ;;  %v1829_v39 = vmul.f32 -1.442695, %v96_v22 }
  0x96   :  { %v2116_v43 = vpop.eup %2115  ;;  %1177 = vperm.xlu0 %1841, %v2096_v25   ;;  %2135 = vrcp.f32 %v464_v40  ;;  %v466_v44 = vadd.f32 1.0, %v2114_v41  ;;  %v97_v40 = vld [vmem:[%s3794_s0 + $0x2b0] sm:$0xff] }
  0x97   :  { %v2118_v45 = vpop.eup %2117  ;;  %2137 = vrcp.f32 %v463_v42  ;;  %v465_v46 = vadd.f32 1.0, %v2116_v43  ;;  %v1828_v43 = vmul.f32 -1.442695, %v95_v28  ;;  %v703_v28 = vld [vmem:[%s3795_s1 + $0xa0] sm:$0xff] }
  0x98   :  { %v2120_v47 = vpop.eup %2119  ;;  %1192 = vperm.xlu1 %1842, %v2098_v27   ;;  %2139 = vrcp.f32 %v466_v44  ;;  %v468_v48 = vadd.f32 1.0, %v2118_v45  ;;  %v1827_v27 = vmul.f32 -1.442695, %v94_v13 }
  0x99   :  { %v2122_v51 = vpop.eup %2121  ;;  %2141 = vrcp.f32 %v465_v46  ;;  %v467_v54 = vadd.f32 1.0, %v2120_v47 }
  0x9a   :  { %v2124_v55 = vpop.eup %2123  ;;  %1187 = vperm.xlu0 %1841, %v2100_v29   ;;  %2143 = vrcp.f32 %v468_v48  ;;  %v470_v58 = vadd.f32 1.0, %v2122_v51  ;;  %v1831_v48 = vmul.f32 -1.442695, %v98_v35 }
  0x9b   :  { %v2126_v59 = vpop.eup %2125  ;;  %v888_v60 = vpop.permute.xlu1 %887  ;;  %2145 = vrcp.f32 %v467_v54  ;;  %v469_v61 = vadd.f32 1.0, %v2124_v55  ;;  %v1830_v54 = vmul.f32 -1.442695, %v97_v40  ;;  %v100_v55 = vld [vmem:[%s3794_s0 + $0x2c8] sm:$0xff] }
  0x9c   :  { %v2128_v1 = vpop.eup %2127  ;;  %v1359_v2 = vmul.f32 %v888_v60, %v687_v52  ;;  %v1360_v3 = vmul.f32 %v888_v60, %v688_v53  ;;  %v878_v4 = vpop.permute.xlu0 %877  ;;  %1202 = vperm.xlu1 %1842, %v2102_v31   ;;  %2147 = vrcp.f32 %v470_v58  ;;  %v472_v5 = vadd.f32 1.0, %v2126_v59  ;;  %v697_v52 = vld [vmem:[%s3795_s1 + $0x70] sm:$0xff]  ;;  %v698_v53 = vld [vmem:[%s3795_s1 + $0x78] sm:$0xff]  ;;  %v696_v58 = vld [vmem:[%s3795_s1 + $0x68] sm:$0xff] }
  0x9d   :  { %v2130_v7 = vpop.eup %2129  ;;  %v1355_v8 = vmul.f32 %v878_v4, %v683_v56  ;;  %v1356_v9 = vmul.f32 %v878_v4, %v684_v57  ;;  %2149 = vrcp.f32 %v469_v61  ;;  %v471_v12 = vadd.f32 1.0, %v2128_v1  ;;  %v695_v57 = vld [vmem:[%s3795_s1 + $0x60] sm:$0xff] }
  0x9e   :  { %v2132_v14 = vpop.eup %2131  ;;  %1552 = vst [vmem:[%s3796_s2 + $0x20] sm:$0xff] %v1359_v2  ;;  %1553 = vst.msk [vmem:[%s3796_s2 + $0x28] sm:$0xff] %vm1548_vm0, %v1360_v3  ;;  %1197 = vperm.xlu0 %1841, %v2130_v7   ;;  %2151 = vrcp.f32 %v472_v5  ;;  %v1833_v1 = vmul.f32 -1.442695, %v100_v55  ;;  %v99_v2 = vld [vmem:[%s3794_s0 + $0x2c0] sm:$0xff]  ;;  %v702_v7 = vld [vmem:[%s3795_s1 + $0x98] sm:$0xff] }
  0x9f   :  { %v2134_v19 = vpop.eup %2133  ;;  %1547 = vst [vmem:[%s3796_s2] sm:$0xff] %v1355_v8  ;;  %1549 = vst.msk [vmem:[%s3796_s2 + $0x8] sm:$0xff] %vm1548_vm0, %v1356_v9  ;;  %v893_v20 = vpop.permute.xlu1 %892  ;;  %2153 = vrcp.f32 %v471_v12  ;;  %v699_v9 = vld [vmem:[%s3795_s1 + $0x80] sm:$0xff] }
  0xa0   :  { %v2136_v23 = vpop.eup %2135  ;;  %v1361_v24 = vmul.f32 %v893_v20, %v689_v10  ;;  %v1362_v25 = vmul.f32 %v893_v20, %v690_v11  ;;  %v883_v26 = vpop.permute.xlu0 %882  ;;  %1212 = vperm.xlu1 %1842, %v2132_v14   ;;  %2155 = vpow2.f32 %v1823_v62  ;;  %v700_v10 = vld [vmem:[%s3795_s1 + $0x88] sm:$0xff]  ;;  %v1832_v14 = vmul.f32 -1.442695, %v99_v2  ;;  %v106_v2 = vld [vmem:[%s3794_s0 + $0x2f8] sm:$0xff] }
  0xa1   :  { %v2138_v29 = vpop.eup %2137  ;;  %v1357_v30 = vmul.f32 %v883_v26, %v685_v15  ;;  %v1358_v31 = vmul.f32 %v883_v26, %v686_v16  ;;  %2157 = vpow2.f32 %v1822_v63  ;;  %v102_v15 = vld [vmem:[%s3794_s0 + $0x2d8] sm:$0xff] }
  0xa2   :  { %v2140_v36 = vpop.eup %2139  ;;  %1554 = vst [vmem:[%s3796_s2 + $0x30] sm:$0xff] %v1361_v24  ;;  %1555 = vst.msk [vmem:[%s3796_s2 + $0x38] sm:$0xff] %vm1548_vm0, %v1362_v25  ;;  %1207 = vperm.xlu0 %1841, %v2134_v19   ;;  %2159 = vpow2.f32 %v1825_v17  ;;  %v705_v24 = vld [vmem:[%s3795_s1 + $0xb0] sm:$0xff]  ;;  %v706_v25 = vld [vmem:[%s3795_s1 + $0xb8] sm:$0xff] }
  0xa3   :  { %v2142_v41 = vpop.eup %2141  ;;  %1550 = vst [vmem:[%s3796_s2 + $0x10] sm:$0xff] %v1357_v30  ;;  %1551 = vst.msk [vmem:[%s3796_s2 + $0x18] sm:$0xff] %vm1548_vm0, %v1358_v31  ;;  %v903_v42 = vpop.permute.xlu1 %902  ;;  %2161 = vpow2.f32 %v1824_v21  ;;  %v1835_v31 = vmul.f32 -1.442695, %v102_v15  ;;  %v717_v15 = vld [vmem:[%s3795_s1 + $0x110] sm:$0xff] }
  0xa4   :  { %v2144_v44 = vpop.eup %2143  ;;  %v1365_v45 = vmul.f32 %v903_v42, %v693_v32  ;;  %v1366_v46 = vmul.f32 %v903_v42, %v694_v33  ;;  %v898_v47 = vpop.permute.xlu0 %897  ;;  %1222 = vperm.xlu1 %1842, %v2136_v23   ;;  %2163 = vpow2.f32 %v1827_v27  ;;  %v709_v42 = vld [vmem:[%s3795_s1 + $0xd0] sm:$0xff] }
  0xa5   :  { %v2571_v49 = vpop.eup %2145  ;;  %v1363_v50 = vmul.f32 %v898_v47, %v691_v37  ;;  %v1364_v51 = vmul.f32 %v898_v47, %v692_v38  ;;  %2165 = vpow2.f32 %v1826_v34 }
  0xa6   :  { %v2582_v56 = vpop.eup %2147  ;;  %1558 = vst [vmem:[%s3796_s2 + $0x50] sm:$0xff] %v1365_v45  ;;  %1559 = vst.msk [vmem:[%s3796_s2 + $0x58] sm:$0xff] %vm1548_vm0, %v1366_v46  ;;  %1217 = vperm.xlu0 %1841, %v2138_v29   ;;  %2167 = vpow2.f32 %v1829_v39  ;;  %v704_v29 = vld [vmem:[%s3795_s1 + $0xa8] sm:$0xff] }
  0xa7   :  { %v2597_v59 = vpop.eup %2149  ;;  %1556 = vst [vmem:[%s3796_s2 + $0x40] sm:$0xff] %v1363_v50  ;;  %1557 = vst.msk [vmem:[%s3796_s2 + $0x48] sm:$0xff] %vm1548_vm0, %v1364_v51  ;;  %v913_v60 = vpop.permute.xlu1 %912  ;;  %2169 = vpow2.f32 %v1828_v43  ;;  %v710_v43 = vld [vmem:[%s3795_s1 + $0xd8] sm:$0xff]  ;;  %v708_v50 = vld [vmem:[%s3795_s1 + $0xc8] sm:$0xff] }
  0xa8   :  { %v2606_v61 = vpop.eup %2151  ;;  %v1369_v62 = vmul.f32 %v913_v60, %v697_v52  ;;  %v1370_v63 = vmul.f32 %v913_v60, %v698_v53  ;;  %v908_v0 = vpop.permute.xlu0 %907  ;;  %1232 = vperm.xlu1 %1842, %v2140_v36   ;;  %2171 = vpow2.f32 %v1831_v48  ;;  %v101_v52 = vld [vmem:[%s3794_s0 + $0x2d0] sm:$0xff] }
  0xa9   :  { %v2611_v3 = vpop.eup %2153  ;;  %v1367_v4 = vmul.f32 %v908_v0, %v695_v57  ;;  %v1368_v5 = vmul.f32 %v908_v0, %v696_v58  ;;  %2173 = vpow2.f32 %v1830_v54  ;;  %v713_v58 = vld [vmem:[%s3795_s1 + $0xf0] sm:$0xff] }
  0xaa   :  { %v2156_v8 = vpop.eup %2155  ;;  %1562 = vst [vmem:[%s3796_s2 + $0x70] sm:$0xff] %v1369_v62  ;;  %1563 = vst.msk [vmem:[%s3796_s2 + $0x78] sm:$0xff] %vm1548_vm0, %v1370_v63  ;;  %1227 = vperm.xlu0 %1841, %v2142_v41   ;;  %2175 = vpow2.f32 %v1833_v1  ;;  %v1834_v1 = vmul.f32 -1.442695, %v101_v52 }
  0xab   :  { %v2158_v11 = vpop.eup %2157  ;;  %1560 = vst [vmem:[%s3796_s2 + $0x60] sm:$0xff] %v1367_v4  ;;  %1561 = vst.msk [vmem:[%s3796_s2 + $0x68] sm:$0xff] %vm1548_vm0, %v1368_v5  ;;  %v923_v12 = vpop.permute.xlu1 %922  ;;  %v474_v13 = vadd.f32 1.0, %v2156_v8 }
  0xac   :  { %v2160_v16 = vpop.eup %2159  ;;  %v1373_v17 = vmul.f32 %v923_v12, %v701_v6  ;;  %v1374_v18 = vmul.f32 %v923_v12, %v702_v7  ;;  %v918_v19 = vpop.permute.xlu0 %917  ;;  %1242 = vperm.xlu1 %1842, %v2144_v44   ;;  %v473_v20 = vadd.f32 1.0, %v2158_v11  ;;  %v711_v6 = vld [vmem:[%s3795_s1 + $0xe0] sm:$0xff]  ;;  %v712_v7 = vld [vmem:[%s3795_s1 + $0xe8] sm:$0xff] }
  0xad   :  { %v2162_v21 = vpop.eup %2161  ;;  %v1371_v22 = vmul.f32 %v918_v19, %v699_v9  ;;  %v1372_v23 = vmul.f32 %v918_v19, %v700_v10  ;;  %2177 = vrcp.f32 %v474_v13  ;;  %v476_v26 = vadd.f32 1.0, %v2160_v16  ;;  %v718_v16 = vld [vmem:[%s3795_s1 + $0x118] sm:$0xff] }
  0xae   :  { %v2164_v27 = vpop.eup %2163  ;;  %1566 = vst [vmem:[%s3796_s2 + $0x90] sm:$0xff] %v1373_v17  ;;  %1567 = vst.msk [vmem:[%s3796_s2 + $0x98] sm:$0xff] %vm1548_vm0, %v1374_v18  ;;  %1237 = vperm.xlu0 %1841, %v2571_v49   ;;  %2179 = vrcp.f32 %v473_v20  ;;  %v475_v30 = vadd.f32 1.0, %v2162_v21  ;;  %v707_v49 = vld [vmem:[%s3795_s1 + $0xc0] sm:$0xff]  ;;  %v1839_v17 = vmul.f32 -1.442695, %v106_v2 }
  0xaf   :  { %v2166_v32 = vpop.eup %2165  ;;  %1564 = vst [vmem:[%s3796_s2 + $0x80] sm:$0xff] %v1371_v22  ;;  %1565 = vst.msk [vmem:[%s3796_s2 + $0x88] sm:$0xff] %vm1548_vm0, %v1372_v23  ;;  %v933_v33 = vpop.permute.xlu1 %932  ;;  %2181 = vrcp.f32 %v476_v26  ;;  %v478_v34 = vadd.f32 1.0, %v2164_v27 }
  0xb0   :  { %v2168_v35 = vpop.eup %2167  ;;  %v1377_v36 = vmul.f32 %v933_v33, %v705_v24  ;;  %v1378_v37 = vmul.f32 %v933_v33, %v706_v25  ;;  %v928_v38 = vpop.permute.xlu0 %927  ;;  %1252 = vperm.xlu1 %1842, %v2582_v56   ;;  %2183 = vpow2.f32 %v1832_v14  ;;  %v477_v44 = vadd.f32 1.0, %v2166_v32  ;;  %v104_v56 = vld [vmem:[%s3794_s0 + $0x2e8] sm:$0xff]  ;;  %v715_v24 = vld [vmem:[%s3795_s1 + $0x100] sm:$0xff]  ;;  %v721_v32 = vld [vmem:[%s3795_s1 + $0x130] sm:$0xff] }
  0xb1   :  { %v2170_v39 = vpop.eup %2169  ;;  %v1375_v40 = vmul.f32 %v928_v38, %v703_v28  ;;  %v1376_v41 = vmul.f32 %v928_v38, %v704_v29  ;;  %2185 = vrcp.f32 %v475_v30  ;;  %v480_v46 = vadd.f32 1.0, %v2168_v35  ;;  %v716_v25 = vld [vmem:[%s3795_s1 + $0x108] sm:$0xff]  ;;  %v722_v33 = vld [vmem:[%s3795_s1 + $0x138] sm:$0xff] }
  0xb2   :  { %v2172_v45 = vpop.eup %2171  ;;  %1570 = vst [vmem:[%s3796_s2 + $0xb0] sm:$0xff] %v1377_v36  ;;  %1571 = vst.msk [vmem:[%s3796_s2 + $0xb8] sm:$0xff] %vm1548_vm0, %v1378_v37  ;;  %1247 = vperm.xlu0 %1841, %v2597_v59   ;;  %2187 = vpow2.f32 %v1835_v31  ;;  %v479_v51 = vadd.f32 1.0, %v2170_v39  ;;  %v714_v59 = vld [vmem:[%s3795_s1 + $0xf8] sm:$0xff]  ;;  %v1837_v8 = vmul.f32 -1.442695, %v104_v56 }
  0xb3   :  { %v2174_v47 = vpop.eup %2173  ;;  %1568 = vst [vmem:[%s3796_s2 + $0xa0] sm:$0xff] %v1375_v40  ;;  %1569 = vst.msk [vmem:[%s3796_s2 + $0xa8] sm:$0xff] %vm1548_vm0, %v1376_v41  ;;  %v943_v48 = vpop.permute.xlu1 %942  ;;  %2189 = vrcp.f32 %v478_v34  ;;  %v482_v55 = vadd.f32 1.0, %v2172_v45  ;;  %v719_v39 = vld [vmem:[%s3795_s1 + $0x120] sm:$0xff]  ;;  %v720_v40 = vld [vmem:[%s3795_s1 + $0x128] sm:$0xff] }
  0xb4   :  { %v1381_v53 = vmul.f32 %v943_v48, %v709_v42  ;;  %v1382_v54 = vmul.f32 %v943_v48, %v710_v43  ;;  %1262 = vperm.xlu1 %1842, %v2606_v61   ;;  %2191 = vrcp.f32 %v477_v44  ;;  %v481_v60 = vadd.f32 1.0, %v2174_v47  ;;  %v103_v61 = vld [vmem:[%s3794_s0 + $0x2e0] sm:$0xff]  ;;  %v2176_v62 = vpop.eup %2175  ;;  %v725_v47 = vld [vmem:[%s3795_s1 + $0x150] sm:$0xff]  ;;  %v726_v48 = vld [vmem:[%s3795_s1 + $0x158] sm:$0xff] }
  0xb5   :  { %v938_v57 = vpop.permute.xlu0 %937  ;;  %2193 = vrcp.f32 %v480_v46  ;;  %v1836_v12 = vmul.f32 -1.442695, %v103_v61  ;;  %v484_v26 = vadd.f32 1.0, %v2176_v62  ;;  %v729_v61 = vld [vmem:[%s3795_s1 + $0x170] sm:$0xff]  ;;  %v730_v62 = vld [vmem:[%s3795_s1 + $0x178] sm:$0xff] }
  0xb6   :  { %1574 = vst [vmem:[%s3796_s2 + $0xd0] sm:$0xff] %v1381_v53  ;;  %1575 = vst.msk [vmem:[%s3796_s2 + $0xd8] sm:$0xff] %vm1548_vm0, %v1382_v54  ;;  %v1379_v63 = vmul.f32 %v938_v57, %v707_v49  ;;  %v1380_v0 = vmul.f32 %v938_v57, %v708_v50  ;;  %1257 = vperm.xlu0 %1841, %v2611_v3   ;;  %2195 = vrcp.f32 %v479_v51  ;;  %v105_v3 = vld [vmem:[%s3794_s0 + $0x2f0] sm:$0xff]  ;;  %v723_v54 = vld [vmem:[%s3795_s1 + $0x140] sm:$0xff] }
  0xb7   :  { %v2178_v4 = vpop.eup %2177  ;;  %v953_v5 = vpop.permute.xlu1 %952  ;;  %2197 = vrcp.f32 %v482_v55  ;;  %v1838_v21 = vmul.f32 -1.442695, %v105_v3  ;;  %v724_v55 = vld [vmem:[%s3795_s1 + $0x148] sm:$0xff] }
  0xb8   :  { %v2180_v9 = vpop.eup %2179  ;;  %1572 = vst [vmem:[%s3796_s2 + $0xc0] sm:$0xff] %v1379_v63  ;;  %1573 = vst.msk [vmem:[%s3796_s2 + $0xc8] sm:$0xff] %vm1548_vm0, %v1380_v0  ;;  %v1385_v10 = vmul.f32 %v953_v5, %v713_v58  ;;  %v1386_v11 = vmul.f32 %v953_v5, %v714_v59  ;;  %1272 = vperm.xlu1 %1842, %v2178_v4   ;;  %2199 = vrcp.f32 %v481_v60 }
  0xb9   :  { %v2182_v13 = vpop.eup %2181  ;;  %v948_v14 = vpop.permute.xlu0 %947  ;;  %2201 = vpow2.f32 %v1834_v1 }
  0xba   :  { %v2184_v18 = vpop.eup %2183  ;;  %1578 = vst [vmem:[%s3796_s2 + $0xf0] sm:$0xff] %v1385_v10  ;;  %1579 = vst.msk [vmem:[%s3796_s2 + $0xf8] sm:$0xff] %vm1548_vm0, %v1386_v11  ;;  %v1383_v19 = vmul.f32 %v948_v14, %v711_v6  ;;  %v1384_v20 = vmul.f32 %v948_v14, %v712_v7  ;;  %1267 = vperm.xlu0 %1841, %v2180_v9   ;;  %2203 = vpow2.f32 %v1837_v8  ;;  %v727_v7 = vld [vmem:[%s3795_s1 + $0x160] sm:$0xff]  ;;  %v728_v8 = vld [vmem:[%s3795_s1 + $0x168] sm:$0xff] }
  0xbb   :  { %v2186_v22 = vpop.eup %2185  ;;  %v963_v23 = vpop.permute.xlu1 %962  ;;  %2205 = vpow2.f32 %v1836_v12  ;;  %v483_v34 = vadd.f32 1.0, %v2184_v18 }
  0xbc   :  { %v2188_v27 = vpop.eup %2187  ;;  %1576 = vst [vmem:[%s3796_s2 + $0xe0] sm:$0xff] %v1383_v19  ;;  %1577 = vst.msk [vmem:[%s3796_s2 + $0xe8] sm:$0xff] %vm1548_vm0, %v1384_v20  ;;  %v1389_v28 = vmul.f32 %v963_v23, %v717_v15  ;;  %v1390_v29 = vmul.f32 %v963_v23, %v718_v16  ;;  %1282 = vperm.xlu1 %1842, %v2182_v13   ;;  %2207 = vpow2.f32 %v1839_v17  ;;  %v733_v15 = vld [vmem:[%s3795_s1 + $0x190] sm:$0xff]  ;;  %v734_v16 = vld [vmem:[%s3795_s1 + $0x198] sm:$0xff] }
  0xbd   :  { %v2190_v30 = vpop.eup %2189  ;;  %v958_v31 = vpop.permute.xlu0 %957  ;;  %2209 = vpow2.f32 %v1838_v21  ;;  %v486_v41 = vadd.f32 1.0, %v2188_v27  ;;  %v732_v23 = vld [vmem:[%s3795_s1 + $0x188] sm:$0xff] }
  0xbe   :  { %1582 = vst [vmem:[%s3796_s2 + $0x110] sm:$0xff] %v1389_v28  ;;  %1583 = vst.msk [vmem:[%s3796_s2 + $0x118] sm:$0xff] %vm1548_vm0, %v1390_v29  ;;  %v1387_v35 = vmul.f32 %v958_v31, %v715_v24  ;;  %v1388_v36 = vmul.f32 %v958_v31, %v716_v25  ;;  %1277 = vperm.xlu0 %1841, %v2186_v22   ;;  %v2192_v37 = vpop.eup %2191  ;;  %2211 = vrcp.f32 %v484_v26  ;;  %v731_v22 = vld [vmem:[%s3795_s1 + $0x180] sm:$0xff]  ;;  %v737_v28 = vld [vmem:[%s3795_s1 + $0x1b0] sm:$0xff] }
  0xbf   :  { %v973_v38 = vpop.permute.xlu1 %972  ;;  %v2194_v42 = vpop.eup %2193  ;;  %2213 = vrcp.f32 %v483_v34  ;;  %v738_v29 = vld [vmem:[%s3795_s1 + $0x1b8] sm:$0xff]  ;;  %v736_v34 = vld [vmem:[%s3795_s1 + $0x1a8] sm:$0xff] }
  0xc0   :  { %1580 = vst [vmem:[%s3796_s2 + $0x100] sm:$0xff] %v1387_v35  ;;  %1581 = vst.msk [vmem:[%s3796_s2 + $0x108] sm:$0xff] %vm1548_vm0, %v1388_v36  ;;  %v1393_v43 = vmul.f32 %v973_v38, %v721_v32  ;;  %v1394_v44 = vmul.f32 %v973_v38, %v722_v33  ;;  %1292 = vperm.xlu1 %1842, %v2190_v30   ;;  %v2196_v45 = vpop.eup %2195  ;;  %2215 = vrcp.f32 %v486_v41  ;;  %v735_v33 = vld [vmem:[%s3795_s1 + $0x1a0] sm:$0xff] }
  0xc1   :  { %v968_v46 = vpop.permute.xlu0 %967  ;;  %v2198_v49 = vpop.eup %2197 }
  0xc2   :  { %1586 = vst [vmem:[%s3796_s2 + $0x130] sm:$0xff] %v1393_v43  ;;  %1587 = vst.msk [vmem:[%s3796_s2 + $0x138] sm:$0xff] %vm1548_vm0, %v1394_v44  ;;  %v1391_v50 = vmul.f32 %v968_v46, %v719_v39  ;;  %v1392_v51 = vmul.f32 %v968_v46, %v720_v40  ;;  %1287 = vperm.xlu0 %1841, %v2192_v37   ;;  %v2200_v52 = vpop.eup %2199  ;;  %v741_v39 = vld [vmem:[%s3795_s1 + $0x1d0] sm:$0xff]  ;;  %v742_v40 = vld [vmem:[%s3795_s1 + $0x1d8] sm:$0xff] }
  0xc3   :  { %v983_v53 = vpop.permute.xlu1 %982  ;;  %v2202_v56 = vpop.eup %2201  ;;  %v739_v46 = vld [vmem:[%s3795_s1 + $0x1c0] sm:$0xff] }
  0xc4   :  { %1584 = vst [vmem:[%s3796_s2 + $0x120] sm:$0xff] %v1391_v50  ;;  %1585 = vst.msk [vmem:[%s3796_s2 + $0x128] sm:$0xff] %vm1548_vm0, %v1392_v51  ;;  %v1397_v57 = vmul.f32 %v983_v53, %v725_v47  ;;  %v1398_v58 = vmul.f32 %v983_v53, %v726_v48  ;;  %1302 = vperm.xlu1 %1842, %v2194_v42   ;;  %v2204_v59 = vpop.eup %2203  ;;  %v485_v63 = vadd.f32 1.0, %v2202_v56  ;;  %v740_v47 = vld [vmem:[%s3795_s1 + $0x1c8] sm:$0xff]  ;;  %v746_v53 = vld [vmem:[%s3795_s1 + $0x1f8] sm:$0xff] }
  0xc5   :  { %v978_v60 = vpop.permute.xlu0 %977  ;;  %v2206_v0 = vpop.eup %2205  ;;  %v488_v4 = vadd.f32 1.0, %v2204_v59  ;;  %v744_v59 = vld [vmem:[%s3795_s1 + $0x1e8] sm:$0xff] }
  0xc6   :  { %1590 = vst [vmem:[%s3796_s2 + $0x150] sm:$0xff] %v1397_v57  ;;  %1591 = vst.msk [vmem:[%s3796_s2 + $0x158] sm:$0xff] %vm1548_vm0, %v1398_v58  ;;  %v1395_v1 = vmul.f32 %v978_v60, %v723_v54  ;;  %v1396_v2 = vmul.f32 %v978_v60, %v724_v55  ;;  %1297 = vperm.xlu0 %1841, %v2196_v45   ;;  %v2208_v5 = vpop.eup %2207  ;;  %2217 = vrcp.f32 %v485_v63  ;;  %v487_v3 = vadd.f32 1.0, %v2206_v0  ;;  %v743_v58 = vld [vmem:[%s3795_s1 + $0x1e0] sm:$0xff]  ;;  %v749_v63 = vld [vmem:[%s3795_s1 + $0x210] sm:$0xff] }
  0xc7   :  { %v993_v6 = vpop.permute.xlu1 %992  ;;  %v2210_v9 = vpop.eup %2209  ;;  %2219 = vrcp.f32 %v488_v4  ;;  %v490_v12 = vadd.f32 1.0, %v2208_v5  ;;  %v750_v0 = vld [vmem:[%s3795_s1 + $0x218] sm:$0xff]  ;;  %v747_v5 = vld [vmem:[%s3795_s1 + $0x200] sm:$0xff] }
  0xc8   :  { %1588 = vst [vmem:[%s3796_s2 + $0x140] sm:$0xff] %v1395_v1  ;;  %1589 = vst.msk [vmem:[%s3796_s2 + $0x148] sm:$0xff] %vm1548_vm0, %v1396_v2  ;;  %v1401_v10 = vmul.f32 %v993_v6, %v729_v61  ;;  %v1402_v11 = vmul.f32 %v993_v6, %v730_v62  ;;  %1312 = vperm.xlu1 %1842, %v2198_v49   ;;  %v2212_v13 = vpop.eup %2211  ;;  %2221 = vrcp.f32 %v487_v3  ;;  %v489_v17 = vadd.f32 1.0, %v2210_v9  ;;  %v748_v6 = vld [vmem:[%s3795_s1 + $0x208] sm:$0xff]  ;;  %v753_v9 = vld [vmem:[%s3795_s1 + $0x230] sm:$0xff] }
  0xc9   :  { %v988_v14 = vpop.permute.xlu0 %987  ;;  %v2214_v20 = vpop.eup %2213  ;;  %2223 = vrcp.f32 %v490_v12 }
  0xca   :  { %1594 = vst [vmem:[%s3796_s2 + $0x170] sm:$0xff] %v1401_v10  ;;  %1595 = vst.msk [vmem:[%s3796_s2 + $0x178] sm:$0xff] %vm1548_vm0, %v1402_v11  ;;  %v1399_v18 = vmul.f32 %v988_v14, %v727_v7  ;;  %v1400_v19 = vmul.f32 %v988_v14, %v728_v8  ;;  %1307 = vperm.xlu0 %1841, %v2200_v52   ;;  %v2216_v26 = vpop.eup %2215  ;;  %2225 = vrcp.f32 %v489_v17  ;;  %v745_v52 = vld [vmem:[%s3795_s1 + $0x1f0] sm:$0xff]  ;;  %v754_v10 = vld [vmem:[%s3795_s1 + $0x238] sm:$0xff] }
  0xcb   :  { %v1003_v21 = vpop.permute.xlu1 %1002  ;;  %v751_v14 = vld [vmem:[%s3795_s1 + $0x220] sm:$0xff] }
  0xcc   :  { %1592 = vst [vmem:[%s3796_s2 + $0x160] sm:$0xff] %v1399_v18  ;;  %1593 = vst.msk [vmem:[%s3796_s2 + $0x168] sm:$0xff] %vm1548_vm0, %v1400_v19  ;;  %v1405_v24 = vmul.f32 %v1003_v21, %v733_v15  ;;  %v1406_v25 = vmul.f32 %v1003_v21, %v734_v16  ;;  %1322 = vperm.xlu1 %1842, %v2212_v13   ;;  %v752_v15 = vld [vmem:[%s3795_s1 + $0x228] sm:$0xff]  ;;  %v757_v19 = vld [vmem:[%s3795_s1 + $0x250] sm:$0xff] }
  0xcd   :  { %v998_v27 = vpop.permute.xlu0 %997 }
  0xce   :  { %1598 = vst [vmem:[%s3796_s2 + $0x190] sm:$0xff] %v1405_v24  ;;  %1599 = vst.msk [vmem:[%s3796_s2 + $0x198] sm:$0xff] %vm1548_vm0, %v1406_v25  ;;  %v1403_v30 = vmul.f32 %v998_v27, %v731_v22  ;;  %v1404_v31 = vmul.f32 %v998_v27, %v732_v23  ;;  %1317 = vperm.xlu0 %1841, %v2214_v20   ;;  %v758_v20 = vld [vmem:[%s3795_s1 + $0x258] sm:$0xff]  ;;  %v755_v24 = vld [vmem:[%s3795_s1 + $0x240] sm:$0xff] }
  0xcf   :  { %v1013_v32 = vpop.permute.xlu1 %1012  ;;  %v756_v25 = vld [vmem:[%s3795_s1 + $0x248] sm:$0xff] }
  0xd0   :  { %1596 = vst [vmem:[%s3796_s2 + $0x180] sm:$0xff] %v1403_v30  ;;  %1597 = vst.msk [vmem:[%s3796_s2 + $0x188] sm:$0xff] %vm1548_vm0, %v1404_v31  ;;  %v1409_v35 = vmul.f32 %v1013_v32, %v737_v28  ;;  %v1410_v36 = vmul.f32 %v1013_v32, %v738_v29  ;;  %1332 = vperm.xlu1 %1842, %v2216_v26   ;;  %v2218_v37 = vpop.eup %2217  ;;  %v761_v29 = vld [vmem:[%s3795_s1 + $0x270] sm:$0xff]  ;;  %v762_v30 = vld [vmem:[%s3795_s1 + $0x278] sm:$0xff] }
  0xd1   :  { %v1008_v38 = vpop.permute.xlu0 %1007  ;;  %v2220_v41 = vpop.eup %2219 }
  0xd2   :  { %1602 = vst [vmem:[%s3796_s2 + $0x1b0] sm:$0xff] %v1409_v35  ;;  %1603 = vst.msk [vmem:[%s3796_s2 + $0x1b8] sm:$0xff] %vm1548_vm0, %v1410_v36  ;;  %v1407_v42 = vmul.f32 %v1008_v38, %v735_v33  ;;  %v1408_v43 = vmul.f32 %v1008_v38, %v736_v34  ;;  %1327 = vperm.xlu0 %1841, %v2218_v37   ;;  %v2222_v44 = vpop.eup %2221  ;;  %v759_v34 = vld [vmem:[%s3795_s1 + $0x260] sm:$0xff]  ;;  %v760_v35 = vld [vmem:[%s3795_s1 + $0x268] sm:$0xff] }
  0xd3   :  { %v1023_v45 = vpop.permute.xlu1 %1022  ;;  %v2224_v50 = vpop.eup %2223 }
  0xd4   :  { %1600 = vst [vmem:[%s3796_s2 + $0x1a0] sm:$0xff] %v1407_v42  ;;  %1601 = vst.msk [vmem:[%s3796_s2 + $0x1a8] sm:$0xff] %vm1548_vm0, %v1408_v43  ;;  %v1413_v48 = vmul.f32 %v1023_v45, %v741_v39  ;;  %v1414_v49 = vmul.f32 %v1023_v45, %v742_v40  ;;  %1342 = vperm.xlu1 %1842, %v2220_v41   ;;  %v2226_v56 = vpop.eup %2225  ;;  %v765_v39 = vld [vmem:[%s3795_s1 + $0x290] sm:$0xff]  ;;  %v766_v40 = vld [vmem:[%s3795_s1 + $0x298] sm:$0xff] }
  0xd5   :  { %v1018_v51 = vpop.permute.xlu0 %1017  ;;  %v764_v45 = vld [vmem:[%s3795_s1 + $0x288] sm:$0xff] }
  0xd6   :  { %1606 = vst [vmem:[%s3796_s2 + $0x1d0] sm:$0xff] %v1413_v48  ;;  %1607 = vst.msk [vmem:[%s3796_s2 + $0x1d8] sm:$0xff] %vm1548_vm0, %v1414_v49  ;;  %v1411_v54 = vmul.f32 %v1018_v51, %v739_v46  ;;  %v1412_v55 = vmul.f32 %v1018_v51, %v740_v47  ;;  %1337 = vperm.xlu0 %1841, %v2222_v44   ;;  %v763_v44 = vld [vmem:[%s3795_s1 + $0x280] sm:$0xff]  ;;  %v769_v49 = vld [vmem:[%s3795_s1 + $0x2b0] sm:$0xff] }
  0xd7   :  { %v1033_v57 = vpop.permute.xlu1 %1032 }
  0xd8   :  { %1604 = vst [vmem:[%s3796_s2 + $0x1c0] sm:$0xff] %v1411_v54  ;;  %1605 = vst.msk [vmem:[%s3796_s2 + $0x1c8] sm:$0xff] %vm1548_vm0, %v1412_v55  ;;  %v1417_v60 = vmul.f32 %v1033_v57, %v745_v52  ;;  %v1418_v61 = vmul.f32 %v1033_v57, %v746_v53  ;;  %1352 = vperm.xlu1 %1842, %v2224_v50   ;;  %v770_v50 = vld [vmem:[%s3795_s1 + $0x2b8] sm:$0xff]  ;;  %v767_v54 = vld [vmem:[%s3795_s1 + $0x2a0] sm:$0xff] }
  0xd9   :  { %v1028_v62 = vpop.permute.xlu0 %1027  ;;  %v768_v55 = vld [vmem:[%s3795_s1 + $0x2a8] sm:$0xff] }
  0xda   :  { %1610 = vst [vmem:[%s3796_s2 + $0x1f0] sm:$0xff] %v1417_v60  ;;  %1611 = vst.msk [vmem:[%s3796_s2 + $0x1f8] sm:$0xff] %vm1548_vm0, %v1418_v61  ;;  %v1415_v1 = vmul.f32 %v1028_v62, %v743_v58  ;;  %v1416_v2 = vmul.f32 %v1028_v62, %v744_v59  ;;  %1347 = vperm.xlu0 %1841, %v2226_v56   ;;  %v773_v59 = vld [vmem:[%s3795_s1 + $0x2d0] sm:$0xff]  ;;  %v774_v60 = vld [vmem:[%s3795_s1 + $0x2d8] sm:$0xff] }
  0xdb   :  { %v1043_v4 = vpop.permute.xlu1 %1042 }
  0xdc   :  { %1608 = vst [vmem:[%s3796_s2 + $0x1e0] sm:$0xff] %v1415_v1  ;;  %1609 = vst.msk [vmem:[%s3796_s2 + $0x1e8] sm:$0xff] %vm1548_vm0, %v1416_v2  ;;  %v1421_v7 = vmul.f32 %v1043_v4, %v749_v63  ;;  %v1422_v8 = vmul.f32 %v1043_v4, %v750_v0  ;;  %v771_v0 = vld [vmem:[%s3795_s1 + $0x2c0] sm:$0xff]  ;;  %v772_v1 = vld [vmem:[%s3795_s1 + $0x2c8] sm:$0xff] }
  0xdd   :  { %v1038_v3 = vpop.permute.xlu0 %1037 }
  0xde   :  { %1614 = vst [vmem:[%s3796_s2 + $0x210] sm:$0xff] %v1421_v7  ;;  %1615 = vst.msk [vmem:[%s3796_s2 + $0x218] sm:$0xff] %vm1548_vm0, %v1422_v8  ;;  %v1419_v11 = vmul.f32 %v1038_v3, %v747_v5  ;;  %v1420_v12 = vmul.f32 %v1038_v3, %v748_v6  ;;  %v777_v6 = vld [vmem:[%s3795_s1 + $0x2f0] sm:$0xff]  ;;  %v778_v7 = vld [vmem:[%s3795_s1 + $0x2f8] sm:$0xff] }
  0xdf   :  { %v1053_v13 = vpop.permute.xlu1 %1052 }
  0xe0   :  { %1612 = vst [vmem:[%s3796_s2 + $0x200] sm:$0xff] %v1419_v11  ;;  %1613 = vst.msk [vmem:[%s3796_s2 + $0x208] sm:$0xff] %vm1548_vm0, %v1420_v12  ;;  %v1425_v16 = vmul.f32 %v1053_v13, %v753_v9  ;;  %v1426_v17 = vmul.f32 %v1053_v13, %v754_v10  ;;  %v775_v10 = vld [vmem:[%s3795_s1 + $0x2e0] sm:$0xff]  ;;  %v776_v11 = vld [vmem:[%s3795_s1 + $0x2e8] sm:$0xff] }
  0xe1   :  { %v1048_v18 = vpop.permute.xlu0 %1047 }
  0xe2   :  { %1618 = vst [vmem:[%s3796_s2 + $0x230] sm:$0xff] %v1425_v16  ;;  %1619 = vst.msk [vmem:[%s3796_s2 + $0x238] sm:$0xff] %vm1548_vm0, %v1426_v17  ;;  %v1423_v21 = vmul.f32 %v1048_v18, %v751_v14  ;;  %v1424_v22 = vmul.f32 %v1048_v18, %v752_v15  ;;  %v781_v15 = vld [vmem:[%s3795_s1 + $0x310] sm:$0xff]  ;;  %v782_v16 = vld [vmem:[%s3795_s1 + $0x318] sm:$0xff] }
  0xe3   :  { %v1063_v23 = vpop.permute.xlu1 %1062 }
  0xe4   :  { %1616 = vst [vmem:[%s3796_s2 + $0x220] sm:$0xff] %v1423_v21  ;;  %1617 = vst.msk [vmem:[%s3796_s2 + $0x228] sm:$0xff] %vm1548_vm0, %v1424_v22  ;;  %v1429_v26 = vmul.f32 %v1063_v23, %v757_v19  ;;  %v1430_v27 = vmul.f32 %v1063_v23, %v758_v20  ;;  %v779_v20 = vld [vmem:[%s3795_s1 + $0x300] sm:$0xff]  ;;  %v780_v21 = vld [vmem:[%s3795_s1 + $0x308] sm:$0xff] }
  0xe5   :  { %v1058_v28 = vpop.permute.xlu0 %1057 }
  0xe6   :  { %1622 = vst [vmem:[%s3796_s2 + $0x250] sm:$0xff] %v1429_v26  ;;  %1623 = vst.msk [vmem:[%s3796_s2 + $0x258] sm:$0xff] %vm1548_vm0, %v1430_v27  ;;  %v1427_v31 = vmul.f32 %v1058_v28, %v755_v24  ;;  %v1428_v32 = vmul.f32 %v1058_v28, %v756_v25  ;;  %v785_v25 = vld [vmem:[%s3795_s1 + $0x330] sm:$0xff]  ;;  %v786_v26 = vld [vmem:[%s3795_s1 + $0x338] sm:$0xff] }
  0xe7   :  { %v1073_v33 = vpop.permute.xlu1 %1072 }
  0xe8   :  { %1620 = vst [vmem:[%s3796_s2 + $0x240] sm:$0xff] %v1427_v31  ;;  %1621 = vst.msk [vmem:[%s3796_s2 + $0x248] sm:$0xff] %vm1548_vm0, %v1428_v32  ;;  %v1433_v36 = vmul.f32 %v1073_v33, %v761_v29  ;;  %v1434_v37 = vmul.f32 %v1073_v33, %v762_v30  ;;  %v783_v30 = vld [vmem:[%s3795_s1 + $0x320] sm:$0xff]  ;;  %v784_v31 = vld [vmem:[%s3795_s1 + $0x328] sm:$0xff] }
  0xe9   :  { %v1068_v38 = vpop.permute.xlu0 %1067 }
  0xea   :  { %1626 = vst [vmem:[%s3796_s2 + $0x270] sm:$0xff] %v1433_v36  ;;  %1627 = vst.msk [vmem:[%s3796_s2 + $0x278] sm:$0xff] %vm1548_vm0, %v1434_v37  ;;  %v1431_v41 = vmul.f32 %v1068_v38, %v759_v34  ;;  %v1432_v42 = vmul.f32 %v1068_v38, %v760_v35  ;;  %v789_v35 = vld [vmem:[%s3795_s1 + $0x350] sm:$0xff]  ;;  %v790_v36 = vld [vmem:[%s3795_s1 + $0x358] sm:$0xff] }
  0xeb   :  { %v1083_v43 = vpop.permute.xlu1 %1082 }
  0xec   :  { %1624 = vst [vmem:[%s3796_s2 + $0x260] sm:$0xff] %v1431_v41  ;;  %1625 = vst.msk [vmem:[%s3796_s2 + $0x268] sm:$0xff] %vm1548_vm0, %v1432_v42  ;;  %v1437_v46 = vmul.f32 %v1083_v43, %v765_v39  ;;  %v1438_v47 = vmul.f32 %v1083_v43, %v766_v40  ;;  %v787_v40 = vld [vmem:[%s3795_s1 + $0x340] sm:$0xff]  ;;  %v788_v41 = vld [vmem:[%s3795_s1 + $0x348] sm:$0xff] }
  0xed   :  { %v1078_v48 = vpop.permute.xlu0 %1077 }
  0xee   :  { %1630 = vst [vmem:[%s3796_s2 + $0x290] sm:$0xff] %v1437_v46  ;;  %1631 = vst.msk [vmem:[%s3796_s2 + $0x298] sm:$0xff] %vm1548_vm0, %v1438_v47  ;;  %v1435_v51 = vmul.f32 %v1078_v48, %v763_v44  ;;  %v1436_v52 = vmul.f32 %v1078_v48, %v764_v45  ;;  %v793_v45 = vld [vmem:[%s3795_s1 + $0x370] sm:$0xff]  ;;  %v794_v46 = vld [vmem:[%s3795_s1 + $0x378] sm:$0xff] }
  0xef   :  { %v1093_v53 = vpop.permute.xlu1 %1092 }
  0xf0   :  { %1628 = vst [vmem:[%s3796_s2 + $0x280] sm:$0xff] %v1435_v51  ;;  %1629 = vst.msk [vmem:[%s3796_s2 + $0x288] sm:$0xff] %vm1548_vm0, %v1436_v52  ;;  %v1441_v56 = vmul.f32 %v1093_v53, %v769_v49  ;;  %v1442_v57 = vmul.f32 %v1093_v53, %v770_v50  ;;  %v791_v50 = vld [vmem:[%s3795_s1 + $0x360] sm:$0xff]  ;;  %v792_v51 = vld [vmem:[%s3795_s1 + $0x368] sm:$0xff] }
  0xf1   :  { %v1088_v58 = vpop.permute.xlu0 %1087 }
  0xf2   :  { %1634 = vst [vmem:[%s3796_s2 + $0x2b0] sm:$0xff] %v1441_v56  ;;  %1635 = vst.msk [vmem:[%s3796_s2 + $0x2b8] sm:$0xff] %vm1548_vm0, %v1442_v57  ;;  %v1439_v61 = vmul.f32 %v1088_v58, %v767_v54  ;;  %v1440_v62 = vmul.f32 %v1088_v58, %v768_v55  ;;  %v797_v55 = vld [vmem:[%s3795_s1 + $0x390] sm:$0xff]  ;;  %v798_v56 = vld [vmem:[%s3795_s1 + $0x398] sm:$0xff] }
  0xf3   :  { %v1103_v63 = vpop.permute.xlu1 %1102 }
  0xf4   :  { %1632 = vst [vmem:[%s3796_s2 + $0x2a0] sm:$0xff] %v1439_v61  ;;  %1633 = vst.msk [vmem:[%s3796_s2 + $0x2a8] sm:$0xff] %vm1548_vm0, %v1440_v62  ;;  %v1445_v2 = vmul.f32 %v1103_v63, %v773_v59  ;;  %v1446_v4 = vmul.f32 %v1103_v63, %v774_v60  ;;  %v795_v60 = vld [vmem:[%s3795_s1 + $0x380] sm:$0xff]  ;;  %v796_v61 = vld [vmem:[%s3795_s1 + $0x388] sm:$0xff] }
  0xf5   :  { %v1098_v5 = vpop.permute.xlu0 %1097 }
  0xf6   :  { %1638 = vst [vmem:[%s3796_s2 + $0x2d0] sm:$0xff] %v1445_v2  ;;  %1639 = vst.msk [vmem:[%s3796_s2 + $0x2d8] sm:$0xff] %vm1548_vm0, %v1446_v4  ;;  %v1443_v8 = vmul.f32 %v1098_v5, %v771_v0  ;;  %v1444_v3 = vmul.f32 %v1098_v5, %v772_v1  ;;  %v801_v1 = vld [vmem:[%s3795_s1 + $0x3b0] sm:$0xff]  ;;  %v802_v2 = vld [vmem:[%s3795_s1 + $0x3b8] sm:$0xff] }
  0xf7   :  { %v1113_v9 = vpop.permute.xlu1 %1112 }
  0xf8   :  { %1636 = vst [vmem:[%s3796_s2 + $0x2c0] sm:$0xff] %v1443_v8  ;;  %1637 = vst.msk [vmem:[%s3796_s2 + $0x2c8] sm:$0xff] %vm1548_vm0, %v1444_v3  ;;  %v1449_v12 = vmul.f32 %v1113_v9, %v777_v6  ;;  %v1450_v13 = vmul.f32 %v1113_v9, %v778_v7  ;;  %v799_v7 = vld [vmem:[%s3795_s1 + $0x3a0] sm:$0xff]  ;;  %v800_v8 = vld [vmem:[%s3795_s1 + $0x3a8] sm:$0xff] }
  0xf9   :  { %v1108_v14 = vpop.permute.xlu0 %1107 }
  0xfa   :  { %1642 = vst [vmem:[%s3796_s2 + $0x2f0] sm:$0xff] %v1449_v12  ;;  %1643 = vst.msk [vmem:[%s3796_s2 + $0x2f8] sm:$0xff] %vm1548_vm0, %v1450_v13  ;;  %v1447_v17 = vmul.f32 %v1108_v14, %v775_v10  ;;  %v1448_v18 = vmul.f32 %v1108_v14, %v776_v11  ;;  %v805_v11 = vld [vmem:[%s3795_s1 + $0x3d0] sm:$0xff]  ;;  %v806_v12 = vld [vmem:[%s3795_s1 + $0x3d8] sm:$0xff] }
  0xfb   :  { %v1123_v19 = vpop.permute.xlu1 %1122 }
  0xfc   :  { %1640 = vst [vmem:[%s3796_s2 + $0x2e0] sm:$0xff] %v1447_v17  ;;  %1641 = vst.msk [vmem:[%s3796_s2 + $0x2e8] sm:$0xff] %vm1548_vm0, %v1448_v18  ;;  %v1453_v22 = vmul.f32 %v1123_v19, %v781_v15  ;;  %v1454_v23 = vmul.f32 %v1123_v19, %v782_v16  ;;  %v803_v16 = vld [vmem:[%s3795_s1 + $0x3c0] sm:$0xff]  ;;  %v804_v17 = vld [vmem:[%s3795_s1 + $0x3c8] sm:$0xff] }
  0xfd   :  { %v1118_v24 = vpop.permute.xlu0 %1117 }
  0xfe   :  { %1646 = vst [vmem:[%s3796_s2 + $0x310] sm:$0xff] %v1453_v22  ;;  %1647 = vst.msk [vmem:[%s3796_s2 + $0x318] sm:$0xff] %vm1548_vm0, %v1454_v23  ;;  %v1451_v27 = vmul.f32 %v1118_v24, %v779_v20  ;;  %v1452_v28 = vmul.f32 %v1118_v24, %v780_v21  ;;  %v809_v21 = vld [vmem:[%s3795_s1 + $0x3f0] sm:$0xff]  ;;  %v810_v22 = vld [vmem:[%s3795_s1 + $0x3f8] sm:$0xff] }
  0xff   :  { %v1133_v29 = vpop.permute.xlu1 %1132 }
 0x100   :  { %1644 = vst [vmem:[%s3796_s2 + $0x300] sm:$0xff] %v1451_v27  ;;  %1645 = vst.msk [vmem:[%s3796_s2 + $0x308] sm:$0xff] %vm1548_vm0, %v1452_v28  ;;  %v1457_v32 = vmul.f32 %v1133_v29, %v785_v25  ;;  %v1458_v33 = vmul.f32 %v1133_v29, %v786_v26  ;;  %v807_v26 = vld [vmem:[%s3795_s1 + $0x3e0] sm:$0xff]  ;;  %v808_v27 = vld [vmem:[%s3795_s1 + $0x3e8] sm:$0xff] }
 0x101   :  { %v1128_v34 = vpop.permute.xlu0 %1127 }
 0x102   :  { %1650 = vst [vmem:[%s3796_s2 + $0x330] sm:$0xff] %v1457_v32  ;;  %1651 = vst.msk [vmem:[%s3796_s2 + $0x338] sm:$0xff] %vm1548_vm0, %v1458_v33  ;;  %v1455_v37 = vmul.f32 %v1128_v34, %v783_v30  ;;  %v1456_v38 = vmul.f32 %v1128_v34, %v784_v31  ;;  %v813_v31 = vld [vmem:[%s3795_s1 + $0x410] sm:$0xff]  ;;  %v814_v32 = vld [vmem:[%s3795_s1 + $0x418] sm:$0xff] }
 0x103   :  { %v1143_v39 = vpop.permute.xlu1 %1142 }
 0x104   :  { %1648 = vst [vmem:[%s3796_s2 + $0x320] sm:$0xff] %v1455_v37  ;;  %1649 = vst.msk [vmem:[%s3796_s2 + $0x328] sm:$0xff] %vm1548_vm0, %v1456_v38  ;;  %v1461_v42 = vmul.f32 %v1143_v39, %v789_v35  ;;  %v1462_v43 = vmul.f32 %v1143_v39, %v790_v36  ;;  %v811_v36 = vld [vmem:[%s3795_s1 + $0x400] sm:$0xff]  ;;  %v812_v37 = vld [vmem:[%s3795_s1 + $0x408] sm:$0xff] }
 0x105   :  { %v1138_v44 = vpop.permute.xlu0 %1137 }
 0x106   :  { %1654 = vst [vmem:[%s3796_s2 + $0x350] sm:$0xff] %v1461_v42  ;;  %1655 = vst.msk [vmem:[%s3796_s2 + $0x358] sm:$0xff] %vm1548_vm0, %v1462_v43  ;;  %v1459_v47 = vmul.f32 %v1138_v44, %v787_v40  ;;  %v1460_v48 = vmul.f32 %v1138_v44, %v788_v41  ;;  %v817_v41 = vld [vmem:[%s3795_s1 + $0x430] sm:$0xff]  ;;  %v818_v42 = vld [vmem:[%s3795_s1 + $0x438] sm:$0xff] }
 0x107   :  { %v1153_v49 = vpop.permute.xlu1 %1152 }
 0x108   :  { %1652 = vst [vmem:[%s3796_s2 + $0x340] sm:$0xff] %v1459_v47  ;;  %1653 = vst.msk [vmem:[%s3796_s2 + $0x348] sm:$0xff] %vm1548_vm0, %v1460_v48  ;;  %v1465_v52 = vmul.f32 %v1153_v49, %v793_v45  ;;  %v1466_v53 = vmul.f32 %v1153_v49, %v794_v46  ;;  %v815_v46 = vld [vmem:[%s3795_s1 + $0x420] sm:$0xff]  ;;  %v816_v47 = vld [vmem:[%s3795_s1 + $0x428] sm:$0xff] }
 0x109   :  { %v1148_v54 = vpop.permute.xlu0 %1147 }
 0x10a   :  { %1658 = vst [vmem:[%s3796_s2 + $0x370] sm:$0xff] %v1465_v52  ;;  %1659 = vst.msk [vmem:[%s3796_s2 + $0x378] sm:$0xff] %vm1548_vm0, %v1466_v53  ;;  %v1463_v57 = vmul.f32 %v1148_v54, %v791_v50  ;;  %v1464_v58 = vmul.f32 %v1148_v54, %v792_v51  ;;  %v821_v51 = vld [vmem:[%s3795_s1 + $0x450] sm:$0xff]  ;;  %v822_v52 = vld [vmem:[%s3795_s1 + $0x458] sm:$0xff] }
 0x10b   :  { %v1163_v59 = vpop.permute.xlu1 %1162 }
 0x10c   :  { %1656 = vst [vmem:[%s3796_s2 + $0x360] sm:$0xff] %v1463_v57  ;;  %1657 = vst.msk [vmem:[%s3796_s2 + $0x368] sm:$0xff] %vm1548_vm0, %v1464_v58  ;;  %v1469_v62 = vmul.f32 %v1163_v59, %v797_v55  ;;  %v1470_v63 = vmul.f32 %v1163_v59, %v798_v56  ;;  %v819_v56 = vld [vmem:[%s3795_s1 + $0x440] sm:$0xff]  ;;  %v820_v57 = vld [vmem:[%s3795_s1 + $0x448] sm:$0xff] }
 0x10d   :  { %v1158_v0 = vpop.permute.xlu0 %1157 }
 0x10e   :  { %1662 = vst [vmem:[%s3796_s2 + $0x390] sm:$0xff] %v1469_v62  ;;  %1663 = vst.msk [vmem:[%s3796_s2 + $0x398] sm:$0xff] %vm1548_vm0, %v1470_v63  ;;  %v1467_v4 = vmul.f32 %v1158_v0, %v795_v60  ;;  %v1468_v5 = vmul.f32 %v1158_v0, %v796_v61  ;;  %v825_v61 = vld [vmem:[%s3795_s1 + $0x470] sm:$0xff]  ;;  %v826_v62 = vld [vmem:[%s3795_s1 + $0x478] sm:$0xff] }
 0x10f   :  { %v1173_v6 = vpop.permute.xlu1 %1172 }
 0x110   :  { %1660 = vst [vmem:[%s3796_s2 + $0x380] sm:$0xff] %v1467_v4  ;;  %1661 = vst.msk [vmem:[%s3796_s2 + $0x388] sm:$0xff] %vm1548_vm0, %v1468_v5  ;;  %v1473_v3 = vmul.f32 %v1173_v6, %v801_v1  ;;  %v1474_v9 = vmul.f32 %v1173_v6, %v802_v2  ;;  %v823_v2 = vld [vmem:[%s3795_s1 + $0x460] sm:$0xff]  ;;  %v824_v4 = vld [vmem:[%s3795_s1 + $0x468] sm:$0xff] }
 0x111   :  { %v1168_v10 = vpop.permute.xlu0 %1167 }
 0x112   :  { %1666 = vst [vmem:[%s3796_s2 + $0x3b0] sm:$0xff] %v1473_v3  ;;  %1667 = vst.msk [vmem:[%s3796_s2 + $0x3b8] sm:$0xff] %vm1548_vm0, %v1474_v9  ;;  %v1471_v13 = vmul.f32 %v1168_v10, %v799_v7  ;;  %v1472_v14 = vmul.f32 %v1168_v10, %v800_v8  ;;  %v829_v8 = vld [vmem:[%s3795_s1 + $0x490] sm:$0xff]  ;;  %v830_v3 = vld [vmem:[%s3795_s1 + $0x498] sm:$0xff] }
 0x113   :  { %v1183_v15 = vpop.permute.xlu1 %1182 }
 0x114   :  { %1664 = vst [vmem:[%s3796_s2 + $0x3a0] sm:$0xff] %v1471_v13  ;;  %1665 = vst.msk [vmem:[%s3796_s2 + $0x3a8] sm:$0xff] %vm1548_vm0, %v1472_v14  ;;  %v1477_v18 = vmul.f32 %v1183_v15, %v805_v11  ;;  %v1478_v19 = vmul.f32 %v1183_v15, %v806_v12  ;;  %v827_v12 = vld [vmem:[%s3795_s1 + $0x480] sm:$0xff]  ;;  %v828_v13 = vld [vmem:[%s3795_s1 + $0x488] sm:$0xff] }
 0x115   :  { %v1178_v20 = vpop.permute.xlu0 %1177 }
 0x116   :  { %1670 = vst [vmem:[%s3796_s2 + $0x3d0] sm:$0xff] %v1477_v18  ;;  %1671 = vst.msk [vmem:[%s3796_s2 + $0x3d8] sm:$0xff] %vm1548_vm0, %v1478_v19  ;;  %v1475_v23 = vmul.f32 %v1178_v20, %v803_v16  ;;  %v1476_v24 = vmul.f32 %v1178_v20, %v804_v17  ;;  %v833_v17 = vld [vmem:[%s3795_s1 + $0x4b0] sm:$0xff]  ;;  %v834_v18 = vld [vmem:[%s3795_s1 + $0x4b8] sm:$0xff] }
 0x117   :  { %v1193_v25 = vpop.permute.xlu1 %1192 }
 0x118   :  { %1668 = vst [vmem:[%s3796_s2 + $0x3c0] sm:$0xff] %v1475_v23  ;;  %1669 = vst.msk [vmem:[%s3796_s2 + $0x3c8] sm:$0xff] %vm1548_vm0, %v1476_v24  ;;  %v1481_v28 = vmul.f32 %v1193_v25, %v809_v21  ;;  %v1482_v29 = vmul.f32 %v1193_v25, %v810_v22  ;;  %v831_v22 = vld [vmem:[%s3795_s1 + $0x4a0] sm:$0xff]  ;;  %v832_v23 = vld [vmem:[%s3795_s1 + $0x4a8] sm:$0xff] }
 0x119   :  { %v1188_v30 = vpop.permute.xlu0 %1187 }
 0x11a   :  { %1674 = vst [vmem:[%s3796_s2 + $0x3f0] sm:$0xff] %v1481_v28  ;;  %1675 = vst.msk [vmem:[%s3796_s2 + $0x3f8] sm:$0xff] %vm1548_vm0, %v1482_v29  ;;  %v1479_v33 = vmul.f32 %v1188_v30, %v807_v26  ;;  %v1480_v34 = vmul.f32 %v1188_v30, %v808_v27  ;;  %v837_v27 = vld [vmem:[%s3795_s1 + $0x4d0] sm:$0xff]  ;;  %v838_v28 = vld [vmem:[%s3795_s1 + $0x4d8] sm:$0xff] }
 0x11b   :  { %v1203_v35 = vpop.permute.xlu1 %1202 }
 0x11c   :  { %1672 = vst [vmem:[%s3796_s2 + $0x3e0] sm:$0xff] %v1479_v33  ;;  %1673 = vst.msk [vmem:[%s3796_s2 + $0x3e8] sm:$0xff] %vm1548_vm0, %v1480_v34  ;;  %v1485_v38 = vmul.f32 %v1203_v35, %v813_v31  ;;  %v1486_v39 = vmul.f32 %v1203_v35, %v814_v32  ;;  %v835_v32 = vld [vmem:[%s3795_s1 + $0x4c0] sm:$0xff]  ;;  %v836_v33 = vld [vmem:[%s3795_s1 + $0x4c8] sm:$0xff] }
 0x11d   :  { %v1198_v40 = vpop.permute.xlu0 %1197 }
 0x11e   :  { %1678 = vst [vmem:[%s3796_s2 + $0x410] sm:$0xff] %v1485_v38  ;;  %1679 = vst.msk [vmem:[%s3796_s2 + $0x418] sm:$0xff] %vm1548_vm0, %v1486_v39  ;;  %v1483_v43 = vmul.f32 %v1198_v40, %v811_v36  ;;  %v1484_v44 = vmul.f32 %v1198_v40, %v812_v37  ;;  %v841_v37 = vld [vmem:[%s3795_s1 + $0x4f0] sm:$0xff]  ;;  %v842_v38 = vld [vmem:[%s3795_s1 + $0x4f8] sm:$0xff] }
 0x11f   :  { %v1213_v45 = vpop.permute.xlu1 %1212 }
 0x120   :  { %1676 = vst [vmem:[%s3796_s2 + $0x400] sm:$0xff] %v1483_v43  ;;  %1677 = vst.msk [vmem:[%s3796_s2 + $0x408] sm:$0xff] %vm1548_vm0, %v1484_v44  ;;  %v1489_v48 = vmul.f32 %v1213_v45, %v817_v41  ;;  %v1490_v49 = vmul.f32 %v1213_v45, %v818_v42  ;;  %v839_v42 = vld [vmem:[%s3795_s1 + $0x4e0] sm:$0xff]  ;;  %v840_v43 = vld [vmem:[%s3795_s1 + $0x4e8] sm:$0xff] }
 0x121   :  { %v1208_v50 = vpop.permute.xlu0 %1207 }
 0x122   :  { %1682 = vst [vmem:[%s3796_s2 + $0x430] sm:$0xff] %v1489_v48  ;;  %1683 = vst.msk [vmem:[%s3796_s2 + $0x438] sm:$0xff] %vm1548_vm0, %v1490_v49  ;;  %v1487_v53 = vmul.f32 %v1208_v50, %v815_v46  ;;  %v1488_v54 = vmul.f32 %v1208_v50, %v816_v47  ;;  %v845_v47 = vld [vmem:[%s3795_s1 + $0x510] sm:$0xff]  ;;  %v846_v48 = vld [vmem:[%s3795_s1 + $0x518] sm:$0xff] }
 0x123   :  { %v1223_v55 = vpop.permute.xlu1 %1222 }
 0x124   :  { %1680 = vst [vmem:[%s3796_s2 + $0x420] sm:$0xff] %v1487_v53  ;;  %1681 = vst.msk [vmem:[%s3796_s2 + $0x428] sm:$0xff] %vm1548_vm0, %v1488_v54  ;;  %v1493_v58 = vmul.f32 %v1223_v55, %v821_v51  ;;  %v1494_v59 = vmul.f32 %v1223_v55, %v822_v52  ;;  %v843_v52 = vld [vmem:[%s3795_s1 + $0x500] sm:$0xff]  ;;  %v844_v53 = vld [vmem:[%s3795_s1 + $0x508] sm:$0xff] }
 0x125   :  { %v1218_v60 = vpop.permute.xlu0 %1217 }
 0x126   :  { %1686 = vst [vmem:[%s3796_s2 + $0x450] sm:$0xff] %v1493_v58  ;;  %1687 = vst.msk [vmem:[%s3796_s2 + $0x458] sm:$0xff] %vm1548_vm0, %v1494_v59  ;;  %v1491_v63 = vmul.f32 %v1218_v60, %v819_v56  ;;  %v1492_v0 = vmul.f32 %v1218_v60, %v820_v57  ;;  %v849_v57 = vld [vmem:[%s3795_s1 + $0x530] sm:$0xff]  ;;  %v850_v58 = vld [vmem:[%s3795_s1 + $0x538] sm:$0xff] }
 0x127   :  { %v1233_v1 = vpop.permute.xlu1 %1232 }
 0x128   :  { %1684 = vst [vmem:[%s3796_s2 + $0x440] sm:$0xff] %v1491_v63  ;;  %1685 = vst.msk [vmem:[%s3796_s2 + $0x448] sm:$0xff] %vm1548_vm0, %v1492_v0  ;;  %v1497_v5 = vmul.f32 %v1233_v1, %v825_v61  ;;  %v1498_v6 = vmul.f32 %v1233_v1, %v826_v62  ;;  %v847_v62 = vld [vmem:[%s3795_s1 + $0x520] sm:$0xff]  ;;  %v848_v63 = vld [vmem:[%s3795_s1 + $0x528] sm:$0xff] }
 0x129   :  { %v1228_v7 = vpop.permute.xlu0 %1227 }
 0x12a   :  { %1690 = vst [vmem:[%s3796_s2 + $0x470] sm:$0xff] %v1497_v5  ;;  %1691 = vst.msk [vmem:[%s3796_s2 + $0x478] sm:$0xff] %vm1548_vm0, %v1498_v6  ;;  %v1495_v9 = vmul.f32 %v1228_v7, %v823_v2  ;;  %v1496_v10 = vmul.f32 %v1228_v7, %v824_v4  ;;  %v853_v4 = vld [vmem:[%s3795_s1 + $0x550] sm:$0xff]  ;;  %v854_v5 = vld [vmem:[%s3795_s1 + $0x558] sm:$0xff] }
 0x12b   :  { %v1243_v11 = vpop.permute.xlu1 %1242 }
 0x12c   :  { %1688 = vst [vmem:[%s3796_s2 + $0x460] sm:$0xff] %v1495_v9  ;;  %1689 = vst.msk [vmem:[%s3796_s2 + $0x468] sm:$0xff] %vm1548_vm0, %v1496_v10  ;;  %v1501_v14 = vmul.f32 %v1243_v11, %v829_v8  ;;  %v1502_v15 = vmul.f32 %v1243_v11, %v830_v3  ;;  %v851_v3 = vld [vmem:[%s3795_s1 + $0x540] sm:$0xff]  ;;  %v852_v9 = vld [vmem:[%s3795_s1 + $0x548] sm:$0xff] }
 0x12d   :  { %v1238_v16 = vpop.permute.xlu0 %1237 }
 0x12e   :  { %1694 = vst [vmem:[%s3796_s2 + $0x490] sm:$0xff] %v1501_v14  ;;  %1695 = vst.msk [vmem:[%s3796_s2 + $0x498] sm:$0xff] %vm1548_vm0, %v1502_v15  ;;  %v1499_v19 = vmul.f32 %v1238_v16, %v827_v12  ;;  %v1500_v20 = vmul.f32 %v1238_v16, %v828_v13  ;;  %v857_v13 = vld [vmem:[%s3795_s1 + $0x570] sm:$0xff]  ;;  %v858_v14 = vld [vmem:[%s3795_s1 + $0x578] sm:$0xff] }
 0x12f   :  { %v1253_v21 = vpop.permute.xlu1 %1252 }
 0x130   :  { %1692 = vst [vmem:[%s3796_s2 + $0x480] sm:$0xff] %v1499_v19  ;;  %1693 = vst.msk [vmem:[%s3796_s2 + $0x488] sm:$0xff] %vm1548_vm0, %v1500_v20  ;;  %v1505_v24 = vmul.f32 %v1253_v21, %v833_v17  ;;  %v1506_v25 = vmul.f32 %v1253_v21, %v834_v18  ;;  %v855_v18 = vld [vmem:[%s3795_s1 + $0x560] sm:$0xff]  ;;  %v856_v19 = vld [vmem:[%s3795_s1 + $0x568] sm:$0xff] }
 0x131   :  { %v1248_v26 = vpop.permute.xlu0 %1247 }
 0x132   :  { %1698 = vst [vmem:[%s3796_s2 + $0x4b0] sm:$0xff] %v1505_v24  ;;  %1699 = vst.msk [vmem:[%s3796_s2 + $0x4b8] sm:$0xff] %vm1548_vm0, %v1506_v25  ;;  %v1503_v29 = vmul.f32 %v1248_v26, %v831_v22  ;;  %v1504_v30 = vmul.f32 %v1248_v26, %v832_v23  ;;  %v861_v23 = vld [vmem:[%s3795_s1 + $0x590] sm:$0xff]  ;;  %v862_v24 = vld [vmem:[%s3795_s1 + $0x598] sm:$0xff] }
 0x133   :  { %v1263_v31 = vpop.permute.xlu1 %1262 }
 0x134   :  { %1696 = vst [vmem:[%s3796_s2 + $0x4a0] sm:$0xff] %v1503_v29  ;;  %1697 = vst.msk [vmem:[%s3796_s2 + $0x4a8] sm:$0xff] %vm1548_vm0, %v1504_v30  ;;  %v1509_v34 = vmul.f32 %v1263_v31, %v837_v27  ;;  %v1510_v35 = vmul.f32 %v1263_v31, %v838_v28  ;;  %v859_v28 = vld [vmem:[%s3795_s1 + $0x580] sm:$0xff]  ;;  %v860_v29 = vld [vmem:[%s3795_s1 + $0x588] sm:$0xff] }
 0x135   :  { %v1258_v36 = vpop.permute.xlu0 %1257 }
 0x136   :  { %1702 = vst [vmem:[%s3796_s2 + $0x4d0] sm:$0xff] %v1509_v34  ;;  %1703 = vst.msk [vmem:[%s3796_s2 + $0x4d8] sm:$0xff] %vm1548_vm0, %v1510_v35  ;;  %v1507_v39 = vmul.f32 %v1258_v36, %v835_v32  ;;  %v1508_v40 = vmul.f32 %v1258_v36, %v836_v33  ;;  %v865_v33 = vld [vmem:[%s3795_s1 + $0x5b0] sm:$0xff]  ;;  %v866_v34 = vld [vmem:[%s3795_s1 + $0x5b8] sm:$0xff] }
 0x137   :  { %v1273_v41 = vpop.permute.xlu1 %1272 }
 0x138   :  { %1700 = vst [vmem:[%s3796_s2 + $0x4c0] sm:$0xff] %v1507_v39  ;;  %1701 = vst.msk [vmem:[%s3796_s2 + $0x4c8] sm:$0xff] %vm1548_vm0, %v1508_v40  ;;  %v1513_v44 = vmul.f32 %v1273_v41, %v841_v37  ;;  %v1514_v45 = vmul.f32 %v1273_v41, %v842_v38  ;;  %v863_v38 = vld [vmem:[%s3795_s1 + $0x5a0] sm:$0xff]  ;;  %v864_v39 = vld [vmem:[%s3795_s1 + $0x5a8] sm:$0xff] }
 0x139   :  { %v1268_v46 = vpop.permute.xlu0 %1267 }
 0x13a   :  { %1706 = vst [vmem:[%s3796_s2 + $0x4f0] sm:$0xff] %v1513_v44  ;;  %1707 = vst.msk [vmem:[%s3796_s2 + $0x4f8] sm:$0xff] %vm1548_vm0, %v1514_v45  ;;  %v1511_v49 = vmul.f32 %v1268_v46, %v839_v42  ;;  %v1512_v50 = vmul.f32 %v1268_v46, %v840_v43  ;;  %v869_v43 = vld [vmem:[%s3795_s1 + $0x5d0] sm:$0xff]  ;;  %v870_v44 = vld [vmem:[%s3795_s1 + $0x5d8] sm:$0xff] }
 0x13b   :  { %v1283_v51 = vpop.permute.xlu1 %1282 }
 0x13c   :  { %1704 = vst [vmem:[%s3796_s2 + $0x4e0] sm:$0xff] %v1511_v49  ;;  %1705 = vst.msk [vmem:[%s3796_s2 + $0x4e8] sm:$0xff] %vm1548_vm0, %v1512_v50  ;;  %v1517_v54 = vmul.f32 %v1283_v51, %v845_v47  ;;  %v1518_v55 = vmul.f32 %v1283_v51, %v846_v48  ;;  %v867_v48 = vld [vmem:[%s3795_s1 + $0x5c0] sm:$0xff]  ;;  %v868_v49 = vld [vmem:[%s3795_s1 + $0x5c8] sm:$0xff] }
 0x13d   :  { %v1278_v56 = vpop.permute.xlu0 %1277 }
 0x13e   :  { %1710 = vst [vmem:[%s3796_s2 + $0x510] sm:$0xff] %v1517_v54  ;;  %1711 = vst.msk [vmem:[%s3796_s2 + $0x518] sm:$0xff] %vm1548_vm0, %v1518_v55  ;;  %v1515_v59 = vmul.f32 %v1278_v56, %v843_v52  ;;  %v1516_v60 = vmul.f32 %v1278_v56, %v844_v53  ;;  %v873_v53 = vld [vmem:[%s3795_s1 + $0x5f0] sm:$0xff]  ;;  %v874_v54 = vld [vmem:[%s3795_s1 + $0x5f8] sm:$0xff] }
 0x13f   :  { %v1293_v61 = vpop.permute.xlu1 %1292 }
 0x140   :  { %1708 = vst [vmem:[%s3796_s2 + $0x500] sm:$0xff] %v1515_v59  ;;  %1709 = vst.msk [vmem:[%s3796_s2 + $0x508] sm:$0xff] %vm1548_vm0, %v1516_v60  ;;  %v1521_v0 = vmul.f32 %v1293_v61, %v849_v57  ;;  %v1522_v1 = vmul.f32 %v1293_v61, %v850_v58  ;;  %v871_v58 = vld [vmem:[%s3795_s1 + $0x5e0] sm:$0xff]  ;;  %v872_v59 = vld [vmem:[%s3795_s1 + $0x5e8] sm:$0xff] }
 0x141   :  { %v1288_v2 = vpop.permute.xlu0 %1287 }
 0x142   :  { %1714 = vst [vmem:[%s3796_s2 + $0x530] sm:$0xff] %v1521_v0  ;;  %1715 = vst.msk [vmem:[%s3796_s2 + $0x538] sm:$0xff] %vm1548_vm0, %v1522_v1  ;;  %v1519_v6 = vmul.f32 %v1288_v2, %v847_v62  ;;  %v1520_v7 = vmul.f32 %v1288_v2, %v848_v63 }
 0x143   :  { %v1303_v8 = vpop.permute.xlu1 %1302 }
 0x144   :  { %1712 = vst [vmem:[%s3796_s2 + $0x520] sm:$0xff] %v1519_v6  ;;  %1713 = vst.msk [vmem:[%s3796_s2 + $0x528] sm:$0xff] %vm1548_vm0, %v1520_v7  ;;  %v1525_v10 = vmul.f32 %v1303_v8, %v853_v4  ;;  %v1526_v11 = vmul.f32 %v1303_v8, %v854_v5 }
 0x145   :  { %v1298_v12 = vpop.permute.xlu0 %1297 }
 0x146   :  { %1718 = vst [vmem:[%s3796_s2 + $0x550] sm:$0xff] %v1525_v10  ;;  %1719 = vst.msk [vmem:[%s3796_s2 + $0x558] sm:$0xff] %vm1548_vm0, %v1526_v11  ;;  %v1523_v15 = vmul.f32 %v1298_v12, %v851_v3  ;;  %v1524_v16 = vmul.f32 %v1298_v12, %v852_v9 }
 0x147   :  { %v1313_v17 = vpop.permute.xlu1 %1312 }
 0x148   :  { %1716 = vst [vmem:[%s3796_s2 + $0x540] sm:$0xff] %v1523_v15  ;;  %1717 = vst.msk [vmem:[%s3796_s2 + $0x548] sm:$0xff] %vm1548_vm0, %v1524_v16  ;;  %v1529_v20 = vmul.f32 %v1313_v17, %v857_v13  ;;  %v1530_v21 = vmul.f32 %v1313_v17, %v858_v14 }
 0x149   :  { %v1308_v22 = vpop.permute.xlu0 %1307 }
 0x14a   :  { %1722 = vst [vmem:[%s3796_s2 + $0x570] sm:$0xff] %v1529_v20  ;;  %1723 = vst.msk [vmem:[%s3796_s2 + $0x578] sm:$0xff] %vm1548_vm0, %v1530_v21  ;;  %v1527_v25 = vmul.f32 %v1308_v22, %v855_v18  ;;  %v1528_v26 = vmul.f32 %v1308_v22, %v856_v19 }
 0x14b   :  { %v1323_v27 = vpop.permute.xlu1 %1322 }
 0x14c   :  { %1720 = vst [vmem:[%s3796_s2 + $0x560] sm:$0xff] %v1527_v25  ;;  %1721 = vst.msk [vmem:[%s3796_s2 + $0x568] sm:$0xff] %vm1548_vm0, %v1528_v26  ;;  %v1533_v30 = vmul.f32 %v1323_v27, %v861_v23  ;;  %v1534_v31 = vmul.f32 %v1323_v27, %v862_v24 }
 0x14d   :  { %v1318_v32 = vpop.permute.xlu0 %1317 }
 0x14e   :  { %1726 = vst [vmem:[%s3796_s2 + $0x590] sm:$0xff] %v1533_v30  ;;  %1727 = vst.msk [vmem:[%s3796_s2 + $0x598] sm:$0xff] %vm1548_vm0, %v1534_v31  ;;  %v1531_v35 = vmul.f32 %v1318_v32, %v859_v28  ;;  %v1532_v36 = vmul.f32 %v1318_v32, %v860_v29 }
 0x14f   :  { %v1333_v37 = vpop.permute.xlu1 %1332 }
 0x150   :  { %1724 = vst [vmem:[%s3796_s2 + $0x580] sm:$0xff] %v1531_v35  ;;  %1725 = vst.msk [vmem:[%s3796_s2 + $0x588] sm:$0xff] %vm1548_vm0, %v1532_v36  ;;  %v1537_v40 = vmul.f32 %v1333_v37, %v865_v33  ;;  %v1538_v41 = vmul.f32 %v1333_v37, %v866_v34 }
 0x151   :  { %v1328_v42 = vpop.permute.xlu0 %1327 }
 0x152   :  { %1730 = vst [vmem:[%s3796_s2 + $0x5b0] sm:$0xff] %v1537_v40  ;;  %1731 = vst.msk [vmem:[%s3796_s2 + $0x5b8] sm:$0xff] %vm1548_vm0, %v1538_v41  ;;  %v1535_v45 = vmul.f32 %v1328_v42, %v863_v38  ;;  %v1536_v46 = vmul.f32 %v1328_v42, %v864_v39 }
 0x153   :  { %v1343_v47 = vpop.permute.xlu1 %1342 }
 0x154   :  { %1728 = vst [vmem:[%s3796_s2 + $0x5a0] sm:$0xff] %v1535_v45  ;;  %1729 = vst.msk [vmem:[%s3796_s2 + $0x5a8] sm:$0xff] %vm1548_vm0, %v1536_v46  ;;  %v1541_v50 = vmul.f32 %v1343_v47, %v869_v43  ;;  %v1542_v51 = vmul.f32 %v1343_v47, %v870_v44 }
 0x155   :  { %v1338_v52 = vpop.permute.xlu0 %1337 }
 0x156   :  { %1734 = vst [vmem:[%s3796_s2 + $0x5d0] sm:$0xff] %v1541_v50  ;;  %1735 = vst.msk [vmem:[%s3796_s2 + $0x5d8] sm:$0xff] %vm1548_vm0, %v1542_v51  ;;  %v1539_v55 = vmul.f32 %v1338_v52, %v867_v48  ;;  %v1540_v56 = vmul.f32 %v1338_v52, %v868_v49 }
 0x157   :  { %v1353_v57 = vpop.permute.xlu1 %1352 }
 0x158   :  { %1732 = vst [vmem:[%s3796_s2 + $0x5c0] sm:$0xff] %v1539_v55  ;;  %1733 = vst.msk [vmem:[%s3796_s2 + $0x5c8] sm:$0xff] %vm1548_vm0, %v1540_v56  ;;  %v1545_v60 = vmul.f32 %v1353_v57, %v873_v53  ;;  %v1546_v61 = vmul.f32 %v1353_v57, %v874_v54 }
 0x159   :  { %v1348_v62 = vpop.permute.xlu0 %1347 }
 0x15a   :  { %1738 = vst [vmem:[%s3796_s2 + $0x5f0] sm:$0xff] %v1545_v60  ;;  %1739 = vst.msk [vmem:[%s3796_s2 + $0x5f8] sm:$0xff] %vm1548_vm0, %v1546_v61  ;;  %v1543_v63 = vmul.f32 %v1348_v62, %v871_v58  ;;  %v1544_v0 = vmul.f32 %v1348_v62, %v872_v59 }
 0x15c   :  { %1736 = vst [vmem:[%s3796_s2 + $0x5e0] sm:$0xff] %v1543_v63  ;;  %1737 = vst.msk [vmem:[%s3796_s2 + $0x5e8] sm:$0xff] %vm1548_vm0, %v1544_v0 }

</bundles_post_ra>
